<compile_context>
chip_gen: v6e
topology: v6e:2x2x1
jax: 0.10.0
libtpu: 0.0.40
codegen_flags: <defaults>
</compile_context>

<pallas_src>
import jax
import jax.numpy as jnp
from jax.experimental import pallas as pl
from jax.experimental.pallas import tpu as pltpu


def _lif_step(v_ref, x, v_threshold):
    """One multi-step of spikingjelly LIFNode(tau=2, decay_input, v_reset=0).

    State is kept in f32 in `v_ref`; returns f32 spikes (exact 0/1).
    """
    v = v_ref[...]                          # single load (read once)
    v = v + (x - v) * 0.5                   # charge: v += (x - v) / tau
    spike = v >= v_threshold                # fire
    v_ref[...] = jnp.where(spike, 0.0, v)   # hard reset to 0
    return spike.astype(jnp.float32)


def ms_block_kernel(
    x_ref,                 # (1, Bs, C, N) input block at (slab, t), f32
    qkvw_ref, qkvb_ref,    # fused q/k/v conv∘bn:  (3C, C) bf16, (3C, 1) f32
    pw_ref, pb_ref,        # proj conv∘bn:         (C, C)  bf16, (C, 1)  f32
    f1w_ref, f1b_ref,      # fc1 conv∘bn:          (H4, C) bf16, (H4, 1) f32
    f2w_ref, f2b_ref,      # fc2 conv∘bn:          (C, H4) bf16, (C, 1)  f32
    out_x_ref,             # (1, Bs, C, N) f32
    out_v_ref,             # (1, Bs, C, N) bf16  (v spikes, returned as "attn")
    sc_v,                  # (Bs, C, N)  shortcut_lif state
    qkv_v,                 # (Bs, 3C, N) fused q/k/v lif state
    th_v,                  # (Bs, C, 1)  talking_heads_lif state
    f1_v,                  # (Bs, C, N)  fc1_lif state
    f2_v,                  # (Bs, H4, N) fc2_lif state
):
    t = pl.program_id(1)
    b_slab = x_ref.shape[1]
    C = x_ref.shape[2]

    @pl.when(t == 0)
    def _():
        # functional.reset_net(): zero every membrane at the start of each
        # slab's time loop (T is the innermost, sequential grid axis).
        sc_v[...] = jnp.zeros_like(sc_v)
        qkv_v[...] = jnp.zeros_like(qkv_v)
        th_v[...] = jnp.zeros_like(th_v)
        f1_v[...] = jnp.zeros_like(f1_v)
        f2_v[...] = jnp.zeros_like(f2_v)

    # Hoist the (single-buffered) weight/bias loads out of the batch loop.
    qkv_w = qkvw_ref[...]
    qkv_b = qkvb_ref[...]
    p_w = pw_ref[...]
    p_b = pb_ref[...]
    f1_w = f1w_ref[...]
    f1_b = f1b_ref[...]
    f2_w = f2w_ref[...]
    f2_b = f2b_ref[...]

    for b in range(b_slab):      # static unroll over the batch slab
        # ---------------- MS_SSA_Conv ----------------
        sc_s = _lif_step(sc_v.at[b], x_ref[0, b], 1.0)          # (C, N) f32 spikes

        # Fused q/k/v projection: one (3C, C) @ (C, N) MXU push (bf16 in, f32 acc).
        qkv_pre = jnp.dot(qkv_w, sc_s.astype(jnp.bfloat16),
                          preferred_element_type=jnp.float32) + qkv_b
        qkv_s = _lif_step(qkv_v.at[b], qkv_pre, 1.0)            # (3C, N) f32 spikes
        q_s = qkv_s[:C]            # C % 8 == 0 -> sublane-aligned f32 slices
        k_s = qkv_s[C:2 * C]
        v_s = qkv_s[2 * C:]

        out_v_ref[0, b] = v_s.astype(jnp.bfloat16)              # "attn" output (0/1)

        # kv = (k * v) summed over the token axis N (per batch): plain lane
        # reduction on the XLU + broadcast-back multiply; no segment matmuls.
        kv_sum = jnp.sum(k_s * v_s, axis=-1, keepdims=True)     # (C, 1)
        kv_spike = _lif_step(th_v.at[b], kv_sum, 0.5)           # talking_heads_lif
        attn_x = q_s * kv_spike                                 # (C, N), exact 0/1

        proj = jnp.dot(p_w, attn_x.astype(jnp.bfloat16),
                       preferred_element_type=jnp.float32) + p_b
        # Residual with the block input: re-read x_ref at the point of use
        # instead of keeping an `identity` value live across the matmuls above.
        x_attn = proj + x_ref[0, b]
        # Stage the MLP residual in the output buffer (frees the live value).
        out_x_ref[0, b] = x_attn

        # ------ MS_MLP_Conv (hidden = mlp_ratio*dim != dim -> no inner res) ------
        f1_s = _lif_step(f1_v.at[b], x_attn, 1.0)               # fc1_lif
        h = jnp.dot(f1_w, f1_s.astype(jnp.bfloat16),
                    preferred_element_type=jnp.float32) + f1_b  # (H4, N)
        f2_s = _lif_step(f2_v.at[b], h, 1.0)                    # fc2_lif
        o = jnp.dot(f2_w, f2_s.astype(jnp.bfloat16),
                    preferred_element_type=jnp.float32) + f2_b  # (C, N)
        out_x_ref[0, b] = out_x_ref[0, b] + o                   # final residual


def _choose_batch_slab(B, C, N, H4, vmem_budget_bytes):
    """Largest batch slab (divisor of B, <= 8) whose per-step VMEM fits."""
    def slab_bytes(bs):
        lif = (C + 3 * C + H4) * N * 4 * bs + C * 128 * 4 * bs   # f32 membrane scratch
        io = 2 * (C * N * 4 + C * N * 4 + C * N * 2) * bs        # 2x-buffered x / out_x / out_v
        live = 10 * C * N * 4 * bs                                # rough peak f32 intermediates
        weights = (3 * C * C + C * C + 2 * H4 * C) * 2            # bf16 weights
        return lif + io + live + weights

    candidates = [d for d in range(1, B + 1) if B % d == 0]
    if B > 1:
        # keep >= 2 slabs so the "parallel" axis can shard across TensorCores
        candidates = [d for d in candidates if d <= B // 2] or [1]
    best = 1
    for d in candidates:
        if d <= 8 and slab_bytes(d) <= vmem_budget_bytes:
            best = max(best, d)
    return best


def ms_block_conv(x, params, num_heads):
    """x: (T, B, C, H, W) f32 -> (out (T,B,C,H,W) f32, attn_v (T,B,heads,N,hd) bf16)."""
    T, B, C, H, W = x.shape
    N = H * W
    H4 = params["fc1_w"].shape[0]
    head_dim = C // num_heads
    assert C % num_heads == 0
    # C % 8 keeps the q/k/v sublane slices of the f32 qkv spikes relayout-free.
    assert C % 8 == 0, "dim must be a multiple of 8"

    # (T,B,C,H,W) -> (T,B,C,N) is a free contiguous reshape; the kernel indexes
    # this native layout directly (no wrapper transpose passes over HBM).
    x4 = x.reshape(T, B, C, N).astype(jnp.float32)

    # Fuse q/k/v into one weight and cast weights to bf16 (BN already folded).
    qkv_w = jnp.concatenate(
        [params["q_w"], params["k_w"], params["v_w"]], axis=0).astype(jnp.bfloat16)
    qkv_b = jnp.concatenate(
        [params["q_b"], params["k_b"], params["v_b"]], axis=0).astype(jnp.float32)
    proj_w = params["proj_w"].astype(jnp.bfloat16)
    proj_b = params["proj_b"].astype(jnp.float32)
    fc1_w = params["fc1_w"].astype(jnp.bfloat16)
    fc1_b = params["fc1_b"].astype(jnp.float32)
    fc2_w = params["fc2_w"].astype(jnp.bfloat16)
    fc2_b = params["fc2_b"].astype(jnp.float32)

    # Generation-aware VMEM budgeting (v7x: 64 MiB/TC vs 128 MiB on v5e/v6e).
    try:
        vmem_cap = int(pltpu.get_tpu_info().vmem_capacity_bytes)
    except Exception:
        vmem_cap = 64 * 1024 * 1024          # conservative fallback (v7x size)
    vmem_limit = min(int(vmem_cap * 0.8), 112 * 1024 * 1024)
    b_slab = _choose_batch_slab(B, C, N, H4, int(vmem_cap * 0.55))
    num_slabs = B // b_slab

    block = (1, b_slab, C, N)
    data_map = lambda s, t: (t, s, 0, 0)
    out_shape = (jax.ShapeDtypeStruct((T, B, C, N), jnp.float32),
                 jax.ShapeDtypeStruct((T, B, C, N), jnp.bfloat16))
    scratch_shapes = [
        pltpu.VMEM((b_slab, C, N), jnp.float32),       # shortcut_lif state
        pltpu.VMEM((b_slab, 3 * C, N), jnp.float32),   # fused q/k/v lif state
        pltpu.VMEM((b_slab, C, 1), jnp.float32),       # talking_heads_lif state
        pltpu.VMEM((b_slab, C, N), jnp.float32),       # fc1_lif state
        pltpu.VMEM((b_slab, H4, N), jnp.float32),      # fc2_lif state
    ]

    def build(single_buffer_consts):
        def const_spec(shape):
            kwargs = {"pipeline_mode": pl.Buffered(1)} if single_buffer_consts else {}
            return pl.BlockSpec(shape, lambda s, t, _n=len(shape): (0,) * _n, **kwargs)

        in_specs = [
            pl.BlockSpec(block, data_map),
            const_spec(qkv_w.shape), const_spec(qkv_b.shape),
            const_spec(proj_w.shape), const_spec(proj_b.shape),
            const_spec(fc1_w.shape), const_spec(fc1_b.shape),
            const_spec(fc2_w.shape), const_spec(fc2_b.shape),
        ]
        out_specs = [pl.BlockSpec(block, data_map), pl.BlockSpec(block, data_map)]
        return pl.pallas_call(
            ms_block_kernel,
            out_shape=out_shape,
            grid_spec=pltpu.PrefetchScalarGridSpec(
                num_scalar_prefetch=0,
                grid=(num_slabs, T),     # T innermost & sequential (LIF state carry)
                in_specs=in_specs,
                out_specs=out_specs,
                scratch_shapes=scratch_shapes,
            ),
            compiler_params=pltpu.CompilerParams(
                dimension_semantics=("parallel", "arbitrary"),
                vmem_limit_bytes=vmem_limit),
        )

    args = (x4, qkv_w, qkv_b, proj_w, proj_b, fc1_w, fc1_b, fc2_w, fc2_b)
    try:
        out_x4, out_v4 = build(single_buffer_consts=True)(*args)
    except Exception:
        # Some jax versions may reject pl.Buffered(1) on top-level BlockSpecs;
        # fall back to default double buffering of the constant operands.
        out_x4, out_v4 = build(single_buffer_consts=False)(*args)

    out_x = out_x4.reshape(T, B, C, H, W)
    # v spikes: (T,B,C,N) -> (T,B,heads,N,head_dim)  (kept bf16; exact 0/1)
    attn_v = (out_v4.reshape(T, B, num_heads, head_dim, N)
              .transpose(0, 1, 2, 4, 3))
    return out_x, attn_v


def _fold_bn(conv_w, conv_b, gamma, beta, mean, var, eps=1e-5):
    """Fold eval-mode BatchNorm2d into a preceding 1x1 conv."""
    a = gamma / jnp.sqrt(var + eps)                     # (Co,)
    w = conv_w * a[:, None]
    if conv_b is None:
        conv_b = jnp.zeros_like(gamma)
    b = a * (conv_b - mean) + beta
    return w.astype(jnp.float32), b[:, None].astype(jnp.float32)


def init_params(key, dim, num_heads, mlp_ratio=4.0):
    """Deterministic synthetic parameters (eval-mode BN folded into convs)."""
    hidden = int(dim * mlp_ratio)
    keys = iter(jax.random.split(key, 64))   # enough keys for all draws

    def conv_w(co, ci):
        return (2.0 / ci) ** 0.5 * jax.random.normal(next(keys), (co, ci), jnp.float32)

    def bn(c):
        gamma = 1.0 + 0.1 * jax.random.normal(next(keys), (c,), jnp.float32)
        beta = 0.1 * jax.random.normal(next(keys), (c,), jnp.float32)
        mean = 0.1 * jax.random.normal(next(keys), (c,), jnp.float32)
        var = 1.0 + 0.1 * jnp.abs(jax.random.normal(next(keys), (c,), jnp.float32))
        return gamma, beta, mean, var

    params = {}
    # q/k/v: Conv2d(dim, dim, 1, bias=False) + BatchNorm2d(dim)
    for name in ("q", "k", "v"):
        w, b = _fold_bn(conv_w(dim, dim), None, *bn(dim))
        params[f"{name}_w"], params[f"{name}_b"] = w, b
    # proj: Conv2d(dim, dim, 1, bias=True) + BatchNorm2d(dim)
    proj_cb = 0.05 * jax.random.normal(next(keys), (dim,), jnp.float32)
    params["proj_w"], params["proj_b"] = _fold_bn(conv_w(dim, dim), proj_cb, *bn(dim))
    # fc1: Conv2d(dim, hidden, 1, bias=True) + BatchNorm2d(hidden)
    fc1_cb = 0.05 * jax.random.normal(next(keys), (hidden,), jnp.float32)
    params["fc1_w"], params["fc1_b"] = _fold_bn(conv_w(hidden, dim), fc1_cb, *bn(hidden))
    # fc2: Conv2d(hidden, dim, 1, bias=True) + BatchNorm2d(dim)
    fc2_cb = 0.05 * jax.random.normal(next(keys), (dim,), jnp.float32)
    params["fc2_w"], params["fc2_b"] = _fold_bn(conv_w(dim, hidden), fc2_cb, *bn(dim))
    # NOTE: talking_heads Conv1d, attn_lif and self.scale are created by the
    # PyTorch module but never used in forward(), so they are not materialized.
    return params


if __name__ == "__main__":
    T, B, C, H, W = 2, 2, 16, 8, 8
    num_heads = 4
    key = jax.random.PRNGKey(0)
    kx, kp = jax.random.split(key)

    x = jax.random.normal(kx, (T, B, C, H, W), jnp.float32)
    params = init_params(kp, C, num_heads, mlp_ratio=4.0)

    out_x, attn_v = ms_block_conv(x, params, num_heads)
    jax.block_until_ready((out_x, attn_v))

    assert out_x.shape == (T, B, C, H, W)
    assert attn_v.shape == (T, B, num_heads, H * W, C // num_heads)
    assert bool(jnp.isfinite(out_x).all())
    # attn (v spikes) must be binary (exact in bf16)
    assert bool(jnp.all((attn_v == 0.0) | (attn_v == 1.0)))
    print("KERNEL_OK")
</pallas_src>

<mosaic_0001>
module attributes {stable_mosaic.version = 11 : i64} {
  func.func @ms_block_kernel(%arg0: i32, %arg1: i32, %arg2: memref<1x1x16x64xf32, #tpu.memory_space<vmem>>, %arg3: memref<48x16xbf16, #tpu.memory_space<vmem>>, %arg4: memref<48x1xf32, #tpu.memory_space<vmem>>, %arg5: memref<16x16xbf16, #tpu.memory_space<vmem>>, %arg6: memref<16x1xf32, #tpu.memory_space<vmem>>, %arg7: memref<64x16xbf16, #tpu.memory_space<vmem>>, %arg8: memref<64x1xf32, #tpu.memory_space<vmem>>, %arg9: memref<16x64xbf16, #tpu.memory_space<vmem>>, %arg10: memref<16x1xf32, #tpu.memory_space<vmem>>, %arg11: memref<1x1x16x64xf32, #tpu.memory_space<vmem>>, %arg12: memref<1x1x16x64xbf16, #tpu.memory_space<vmem>>, %arg13: memref<1x16x64xf32, #tpu.memory_space<vmem>>, %arg14: memref<1x48x64xf32, #tpu.memory_space<vmem>>, %arg15: memref<1x16x1xf32, #tpu.memory_space<vmem>>, %arg16: memref<1x16x64xf32, #tpu.memory_space<vmem>>, %arg17: memref<1x64x64xf32, #tpu.memory_space<vmem>>) attributes {dimension_semantics = [#tpu.dimension_semantics<parallel>, #tpu.dimension_semantics<arbitrary>], iteration_bounds = array<i64: 2, 2>, scalar_prefetch = 0 : i64, scratch_operands = 5 : i64, tpu.core_type = #tpu.core_type<tc>, window_params = [{transform_indices = @transform_0, window_bounds = array<i64: 1, 1, 16, 64>}, {pipeline_mode = #tpu.pipeline_mode<synchronous>, transform_indices = @transform_1, window_bounds = array<i64: 48, 16>}, {pipeline_mode = #tpu.pipeline_mode<synchronous>, transform_indices = @transform_2, window_bounds = array<i64: 48, 1>}, {pipeline_mode = #tpu.pipeline_mode<synchronous>, transform_indices = @transform_3, window_bounds = array<i64: 16, 16>}, {pipeline_mode = #tpu.pipeline_mode<synchronous>, transform_indices = @transform_4, window_bounds = array<i64: 16, 1>}, {pipeline_mode = #tpu.pipeline_mode<synchronous>, transform_indices = @transform_5, window_bounds = array<i64: 64, 16>}, {pipeline_mode = #tpu.pipeline_mode<synchronous>, transform_indices = @transform_6, window_bounds = array<i64: 64, 1>}, {pipeline_mode = #tpu.pipeline_mode<synchronous>, transform_indices = @transform_7, window_bounds = array<i64: 16, 64>}, {pipeline_mode = #tpu.pipeline_mode<synchronous>, transform_indices = @transform_8, window_bounds = array<i64: 16, 1>}, {transform_indices = @transform_9, window_bounds = array<i64: 1, 1, 16, 64>}, {transform_indices = @transform_10, window_bounds = array<i64: 1, 1, 16, 64>}]} {
    %c0_i32 = arith.constant 0 : i32
    %0 = arith.cmpi eq, %arg1, %c0_i32 : i32
    %1 = arith.extui %0 : i1 to i32
    %c0_i32_0 = arith.constant 0 : i32
    %2 = arith.cmpi ne, %1, %c0_i32_0 : i32
    scf.if %2 {
      %cst_89 = arith.constant 0.000000e+00 : f32
      %128 = vector.broadcast %cst_89 : f32 to vector<1x16x64xf32>
      %c0_90 = arith.constant 0 : index
      %c0_91 = arith.constant 0 : index
      %c0_92 = arith.constant 0 : index
      %129 = vector.load %arg13[%c0_90, %c0_91, %c0_92] : memref<1x16x64xf32, #tpu.memory_space<vmem>>, vector<1x16x64xf32>
      tpu.vector_store %arg13[%c0_90, %c0_91, %c0_92], %128 {strides = array<i32>} : memref<1x16x64xf32, #tpu.memory_space<vmem>>, vector<1x16x64xf32>,
      %cst_93 = arith.constant 0.000000e+00 : f32
      %130 = vector.broadcast %cst_93 : f32 to vector<1x48x64xf32>
      %c0_94 = arith.constant 0 : index
      %c0_95 = arith.constant 0 : index
      %c0_96 = arith.constant 0 : index
      %131 = vector.load %arg14[%c0_94, %c0_95, %c0_96] : memref<1x48x64xf32, #tpu.memory_space<vmem>>, vector<1x48x64xf32>
      tpu.vector_store %arg14[%c0_94, %c0_95, %c0_96], %130 {strides = array<i32>} : memref<1x48x64xf32, #tpu.memory_space<vmem>>, vector<1x48x64xf32>,
      %cst_97 = arith.constant 0.000000e+00 : f32
      %132 = vector.broadcast %cst_97 : f32 to vector<1x16x1xf32>
      %c0_98 = arith.constant 0 : index
      %c0_99 = arith.constant 0 : index
      %c0_100 = arith.constant 0 : index
      %133 = vector.load %arg15[%c0_98, %c0_99, %c0_100] : memref<1x16x1xf32, #tpu.memory_space<vmem>>, vector<1x16x1xf32>
      tpu.vector_store %arg15[%c0_98, %c0_99, %c0_100], %132 {strides = array<i32>} : memref<1x16x1xf32, #tpu.memory_space<vmem>>, vector<1x16x1xf32>,
      %cst_101 = arith.constant 0.000000e+00 : f32
      %134 = vector.broadcast %cst_101 : f32 to vector<1x16x64xf32>
      %c0_102 = arith.constant 0 : index
      %c0_103 = arith.constant 0 : index
      %c0_104 = arith.constant 0 : index
      %135 = vector.load %arg16[%c0_102, %c0_103, %c0_104] : memref<1x16x64xf32, #tpu.memory_space<vmem>>, vector<1x16x64xf32>
      tpu.vector_store %arg16[%c0_102, %c0_103, %c0_104], %134 {strides = array<i32>} : memref<1x16x64xf32, #tpu.memory_space<vmem>>, vector<1x16x64xf32>,
      %cst_105 = arith.constant 0.000000e+00 : f32
      %136 = vector.broadcast %cst_105 : f32 to vector<1x64x64xf32>
      %c0_106 = arith.constant 0 : index
      %c0_107 = arith.constant 0 : index
      %c0_108 = arith.constant 0 : index
      %137 = vector.load %arg17[%c0_106, %c0_107, %c0_108] : memref<1x64x64xf32, #tpu.memory_space<vmem>>, vector<1x64x64xf32>
      tpu.vector_store %arg17[%c0_106, %c0_107, %c0_108], %136 {strides = array<i32>} : memref<1x64x64xf32, #tpu.memory_space<vmem>>, vector<1x64x64xf32>,
    } else {
    }
    %c0 = arith.constant 0 : index
    %c0_1 = arith.constant 0 : index
    %3 = vector.load %arg3[%c0, %c0_1] : memref<48x16xbf16, #tpu.memory_space<vmem>>, vector<48x16xbf16>
    %c0_2 = arith.constant 0 : index
    %c0_3 = arith.constant 0 : index
    %4 = vector.load %arg4[%c0_2, %c0_3] : memref<48x1xf32, #tpu.memory_space<vmem>>, vector<48x1xf32>
    %c0_4 = arith.constant 0 : index
    %c0_5 = arith.constant 0 : index
    %5 = vector.load %arg5[%c0_4, %c0_5] : memref<16x16xbf16, #tpu.memory_space<vmem>>, vector<16x16xbf16>
    %c0_6 = arith.constant 0 : index
    %c0_7 = arith.constant 0 : index
    %6 = vector.load %arg6[%c0_6, %c0_7] : memref<16x1xf32, #tpu.memory_space<vmem>>, vector<16x1xf32>
    %c0_8 = arith.constant 0 : index
    %c0_9 = arith.constant 0 : index
    %7 = vector.load %arg7[%c0_8, %c0_9] : memref<64x16xbf16, #tpu.memory_space<vmem>>, vector<64x16xbf16>
    %c0_10 = arith.constant 0 : index
    %c0_11 = arith.constant 0 : index
    %8 = vector.load %arg8[%c0_10, %c0_11] : memref<64x1xf32, #tpu.memory_space<vmem>>, vector<64x1xf32>
    %c0_12 = arith.constant 0 : index
    %c0_13 = arith.constant 0 : index
    %9 = vector.load %arg9[%c0_12, %c0_13] : memref<16x64xbf16, #tpu.memory_space<vmem>>, vector<16x64xbf16>
    %c0_14 = arith.constant 0 : index
    %c0_15 = arith.constant 0 : index
    %10 = vector.load %arg10[%c0_14, %c0_15] : memref<16x1xf32, #tpu.memory_space<vmem>>, vector<16x1xf32>
    %c0_16 = arith.constant 0 : index
    %c0_17 = arith.constant 0 : index
    %c0_18 = arith.constant 0 : index
    %c0_19 = arith.constant 0 : index
    %11 = vector.load %arg2[%c0_16, %c0_17, %c0_18, %c0_19] : memref<1x1x16x64xf32, #tpu.memory_space<vmem>>, vector<1x1x16x64xf32>
    %12 = vector.shape_cast %11 : vector<1x1x16x64xf32> to vector<16x64xf32>
    %c0_20 = arith.constant 0 : index
    %c0_21 = arith.constant 0 : index
    %c0_22 = arith.constant 0 : index
    %13 = vector.load %arg13[%c0_20, %c0_21, %c0_22] : memref<1x16x64xf32, #tpu.memory_space<vmem>>, vector<1x16x64xf32>
    %14 = vector.shape_cast %13 : vector<1x16x64xf32> to vector<16x64xf32>
    %15 = arith.subf %12, %14 : vector<16x64xf32>
    %cst = arith.constant 5.000000e-01 : f32
    %16 = vector.broadcast %cst : f32 to vector<16x64xf32>
    %17 = arith.mulf %15, %16 : vector<16x64xf32>
    %18 = arith.addf %14, %17 : vector<16x64xf32>
    %cst_23 = arith.constant 1.000000e+00 : f32
    %19 = vector.broadcast %cst_23 : f32 to vector<16x64xf32>
    %20 = arith.cmpf oge, %18, %19 : vector<16x64xf32>
    %cst_24 = arith.constant 0.000000e+00 : f32
    %21 = vector.broadcast %cst_24 : f32 to vector<16x64xf32>
    %22 = arith.select %20, %21, %18 : vector<16x64xi1>, vector<16x64xf32>
    %c0_25 = arith.constant 0 : index
    %c0_26 = arith.constant 0 : index
    %c0_27 = arith.constant 0 : index
    %23 = vector.load %arg13[%c0_25, %c0_26, %c0_27] : memref<1x16x64xf32, #tpu.memory_space<vmem>>, vector<1x16x64xf32>
    %24 = vector.shape_cast %23 : vector<1x16x64xf32> to vector<16x64xf32>
    %25 = vector.shape_cast %22 : vector<16x64xf32> to vector<1x16x64xf32>
    tpu.vector_store %arg13[%c0_25, %c0_26, %c0_27], %25 {strides = array<i32>} : memref<1x16x64xf32, #tpu.memory_space<vmem>>, vector<1x16x64xf32>,
    %26 = arith.extui %20 : vector<16x64xi1> to vector<16x64xi32>
    %27 = arith.sitofp %26 : vector<16x64xi32> to vector<16x64xf32>
    %28 = arith.truncf %27 : vector<16x64xf32> to vector<16x64xbf16>
    %cst_28 = arith.constant dense<0.000000e+00> : vector<48x64xf32>
    %29 = tpu.matmul %3, %28, %cst_28 {dimension_numbers = #tpu.dot_dimension_numbers<[1], [0], [0], [1], [0, 0, 1, 1], [], []>} : vector<48x16xbf16>, vector<16x64xbf16>, vector<48x64xf32> -> vector<48x64xf32>
    %30 = vector.broadcast %4 : vector<48x1xf32> to vector<48x64xf32>
    %31 = arith.addf %29, %30 : vector<48x64xf32>
    %c0_29 = arith.constant 0 : index
    %c0_30 = arith.constant 0 : index
    %c0_31 = arith.constant 0 : index
    %32 = vector.load %arg14[%c0_29, %c0_30, %c0_31] : memref<1x48x64xf32, #tpu.memory_space<vmem>>, vector<1x48x64xf32>
    %33 = vector.shape_cast %32 : vector<1x48x64xf32> to vector<48x64xf32>
    %34 = arith.subf %31, %33 : vector<48x64xf32>
    %cst_32 = arith.constant 5.000000e-01 : f32
    %35 = vector.broadcast %cst_32 : f32 to vector<48x64xf32>
    %36 = arith.mulf %34, %35 : vector<48x64xf32>
    %37 = arith.addf %33, %36 : vector<48x64xf32>
    %cst_33 = arith.constant 1.000000e+00 : f32
    %38 = vector.broadcast %cst_33 : f32 to vector<48x64xf32>
    %39 = arith.cmpf oge, %37, %38 : vector<48x64xf32>
    %cst_34 = arith.constant 0.000000e+00 : f32
    %40 = vector.broadcast %cst_34 : f32 to vector<48x64xf32>
    %41 = arith.select %39, %40, %37 : vector<48x64xi1>, vector<48x64xf32>
    %c0_35 = arith.constant 0 : index
    %c0_36 = arith.constant 0 : index
    %c0_37 = arith.constant 0 : index
    %42 = vector.load %arg14[%c0_35, %c0_36, %c0_37] : memref<1x48x64xf32, #tpu.memory_space<vmem>>, vector<1x48x64xf32>
    %43 = vector.shape_cast %42 : vector<1x48x64xf32> to vector<48x64xf32>
    %44 = vector.shape_cast %41 : vector<48x64xf32> to vector<1x48x64xf32>
    tpu.vector_store %arg14[%c0_35, %c0_36, %c0_37], %44 {strides = array<i32>} : memref<1x48x64xf32, #tpu.memory_space<vmem>>, vector<1x48x64xf32>,
    %45 = arith.extui %39 : vector<48x64xi1> to vector<48x64xi32>
    %46 = arith.sitofp %45 : vector<48x64xi32> to vector<48x64xf32>
    %47 = vector.extract_strided_slice %46 {offsets = [0, 0], sizes = [16, 64], strides = [1, 1]} : vector<48x64xf32> to vector<16x64xf32>
    %48 = vector.extract_strided_slice %46 {offsets = [16, 0], sizes = [16, 64], strides = [1, 1]} : vector<48x64xf32> to vector<16x64xf32>
    %49 = vector.extract_strided_slice %46 {offsets = [32, 0], sizes = [16, 64], strides = [1, 1]} : vector<48x64xf32> to vector<16x64xf32>
    %50 = arith.truncf %49 : vector<16x64xf32> to vector<16x64xbf16>
    %c0_38 = arith.constant 0 : index
    %c0_39 = arith.constant 0 : index
    %c0_40 = arith.constant 0 : index
    %c0_41 = arith.constant 0 : index
    %51 = vector.load %arg12[%c0_38, %c0_39, %c0_40, %c0_41] : memref<1x1x16x64xbf16, #tpu.memory_space<vmem>>, vector<1x1x16x64xbf16>
    %52 = vector.shape_cast %51 : vector<1x1x16x64xbf16> to vector<16x64xbf16>
    %53 = vector.shape_cast %50 : vector<16x64xbf16> to vector<1x1x16x64xbf16>
    tpu.vector_store %arg12[%c0_38, %c0_39, %c0_40, %c0_41], %53 {strides = array<i32>} : memref<1x1x16x64xbf16, #tpu.memory_space<vmem>>, vector<1x1x16x64xbf16>,
    %54 = arith.mulf %48, %49 : vector<16x64xf32>
    %cst_42 = arith.constant dense<0.000000e+00> : vector<16xf32>
    %55 = vector.multi_reduction <add>, %54, %cst_42 [1] : vector<16x64xf32> to vector<16xf32>
    %56 = vector.shape_cast %55 : vector<16xf32> to vector<16x1xf32>
    %c0_43 = arith.constant 0 : index
    %c0_44 = arith.constant 0 : index
    %c0_45 = arith.constant 0 : index
    %57 = vector.load %arg15[%c0_43, %c0_44, %c0_45] : memref<1x16x1xf32, #tpu.memory_space<vmem>>, vector<1x16x1xf32>
    %58 = vector.shape_cast %57 : vector<1x16x1xf32> to vector<16x1xf32>
    %59 = arith.subf %56, %58 : vector<16x1xf32>
    %cst_46 = arith.constant 5.000000e-01 : f32
    %60 = vector.broadcast %cst_46 : f32 to vector<16x1xf32>
    %61 = arith.mulf %59, %60 : vector<16x1xf32>
    %62 = arith.addf %58, %61 : vector<16x1xf32>
    %cst_47 = arith.constant 5.000000e-01 : f32
    %63 = vector.broadcast %cst_47 : f32 to vector<16x1xf32>
    %64 = arith.cmpf oge, %62, %63 : vector<16x1xf32>
    %cst_48 = arith.constant 0.000000e+00 : f32
    %65 = vector.broadcast %cst_48 : f32 to vector<16x1xf32>
    %66 = arith.select %64, %65, %62 : vector<16x1xi1>, vector<16x1xf32>
    %c0_49 = arith.constant 0 : index
    %c0_50 = arith.constant 0 : index
    %c0_51 = arith.constant 0 : index
    %67 = vector.load %arg15[%c0_49, %c0_50, %c0_51] : memref<1x16x1xf32, #tpu.memory_space<vmem>>, vector<1x16x1xf32>
    %68 = vector.shape_cast %67 : vector<1x16x1xf32> to vector<16x1xf32>
    %69 = vector.shape_cast %66 : vector<16x1xf32> to vector<1x16x1xf32>
    tpu.vector_store %arg15[%c0_49, %c0_50, %c0_51], %69 {strides = array<i32>} : memref<1x16x1xf32, #tpu.memory_space<vmem>>, vector<1x16x1xf32>,
    %70 = arith.extui %64 : vector<16x1xi1> to vector<16x1xi32>
    %71 = arith.sitofp %70 : vector<16x1xi32> to vector<16x1xf32>
    %72 = vector.broadcast %71 : vector<16x1xf32> to vector<16x64xf32>
    %73 = arith.mulf %47, %72 : vector<16x64xf32>
    %74 = arith.truncf %73 : vector<16x64xf32> to vector<16x64xbf16>
    %cst_52 = arith.constant dense<0.000000e+00> : vector<16x64xf32>
    %75 = tpu.matmul %5, %74, %cst_52 {dimension_numbers = #tpu.dot_dimension_numbers<[1], [0], [0], [1], [0, 0, 1, 1], [], []>} : vector<16x16xbf16>, vector<16x64xbf16>, vector<16x64xf32> -> vector<16x64xf32>
    %76 = vector.broadcast %6 : vector<16x1xf32> to vector<16x64xf32>
    %77 = arith.addf %75, %76 : vector<16x64xf32>
    %c0_53 = arith.constant 0 : index
    %c0_54 = arith.constant 0 : index
    %c0_55 = arith.constant 0 : index
    %c0_56 = arith.constant 0 : index
    %78 = vector.load %arg2[%c0_53, %c0_54, %c0_55, %c0_56] : memref<1x1x16x64xf32, #tpu.memory_space<vmem>>, vector<1x1x16x64xf32>
    %79 = vector.shape_cast %78 : vector<1x1x16x64xf32> to vector<16x64xf32>
    %80 = arith.addf %77, %79 : vector<16x64xf32>
    %c0_57 = arith.constant 0 : index
    %c0_58 = arith.constant 0 : index
    %c0_59 = arith.constant 0 : index
    %c0_60 = arith.constant 0 : index
    %81 = vector.load %arg11[%c0_57, %c0_58, %c0_59, %c0_60] : memref<1x1x16x64xf32, #tpu.memory_space<vmem>>, vector<1x1x16x64xf32>
    %82 = vector.shape_cast %81 : vector<1x1x16x64xf32> to vector<16x64xf32>
    %83 = vector.shape_cast %80 : vector<16x64xf32> to vector<1x1x16x64xf32>
    tpu.vector_store %arg11[%c0_57, %c0_58, %c0_59, %c0_60], %83 {strides = array<i32>} : memref<1x1x16x64xf32, #tpu.memory_space<vmem>>, vector<1x1x16x64xf32>,
    %c0_61 = arith.constant 0 : index
    %c0_62 = arith.constant 0 : index
    %c0_63 = arith.constant 0 : index
    %84 = vector.load %arg16[%c0_61, %c0_62, %c0_63] : memref<1x16x64xf32, #tpu.memory_space<vmem>>, vector<1x16x64xf32>
    %85 = vector.shape_cast %84 : vector<1x16x64xf32> to vector<16x64xf32>
    %86 = arith.subf %80, %85 : vector<16x64xf32>
    %cst_64 = arith.constant 5.000000e-01 : f32
    %87 = vector.broadcast %cst_64 : f32 to vector<16x64xf32>
    %88 = arith.mulf %86, %87 : vector<16x64xf32>
    %89 = arith.addf %85, %88 : vector<16x64xf32>
    %cst_65 = arith.constant 1.000000e+00 : f32
    %90 = vector.broadcast %cst_65 : f32 to vector<16x64xf32>
    %91 = arith.cmpf oge, %89, %90 : vector<16x64xf32>
    %cst_66 = arith.constant 0.000000e+00 : f32
    %92 = vector.broadcast %cst_66 : f32 to vector<16x64xf32>
    %93 = arith.select %91, %92, %89 : vector<16x64xi1>, vector<16x64xf32>
    %c0_67 = arith.constant 0 : index
    %c0_68 = arith.constant 0 : index
    %c0_69 = arith.constant 0 : index
    %94 = vector.load %arg16[%c0_67, %c0_68, %c0_69] : memref<1x16x64xf32, #tpu.memory_space<vmem>>, vector<1x16x64xf32>
    %95 = vector.shape_cast %94 : vector<1x16x64xf32> to vector<16x64xf32>
    %96 = vector.shape_cast %93 : vector<16x64xf32> to vector<1x16x64xf32>
    tpu.vector_store %arg16[%c0_67, %c0_68, %c0_69], %96 {strides = array<i32>} : memref<1x16x64xf32, #tpu.memory_space<vmem>>, vector<1x16x64xf32>,
    %97 = arith.extui %91 : vector<16x64xi1> to vector<16x64xi32>
    %98 = arith.sitofp %97 : vector<16x64xi32> to vector<16x64xf32>
    %99 = arith.truncf %98 : vector<16x64xf32> to vector<16x64xbf16>
    %cst_70 = arith.constant dense<0.000000e+00> : vector<64x64xf32>
    %100 = tpu.matmul %7, %99, %cst_70 {dimension_numbers = #tpu.dot_dimension_numbers<[1], [0], [0], [1], [0, 0, 1, 1], [], []>} : vector<64x16xbf16>, vector<16x64xbf16>, vector<64x64xf32> -> vector<64x64xf32>
    %101 = vector.broadcast %8 : vector<64x1xf32> to vector<64x64xf32>
    %102 = arith.addf %100, %101 : vector<64x64xf32>
    %c0_71 = arith.constant 0 : index
    %c0_72 = arith.constant 0 : index
    %c0_73 = arith.constant 0 : index
    %103 = vector.load %arg17[%c0_71, %c0_72, %c0_73] : memref<1x64x64xf32, #tpu.memory_space<vmem>>, vector<1x64x64xf32>
    %104 = vector.shape_cast %103 : vector<1x64x64xf32> to vector<64x64xf32>
    %105 = arith.subf %102, %104 : vector<64x64xf32>
    %cst_74 = arith.constant 5.000000e-01 : f32
    %106 = vector.broadcast %cst_74 : f32 to vector<64x64xf32>
    %107 = arith.mulf %105, %106 : vector<64x64xf32>
    %108 = arith.addf %104, %107 : vector<64x64xf32>
    %cst_75 = arith.constant 1.000000e+00 : f32
    %109 = vector.broadcast %cst_75 : f32 to vector<64x64xf32>
    %110 = arith.cmpf oge, %108, %109 : vector<64x64xf32>
    %cst_76 = arith.constant 0.000000e+00 : f32
    %111 = vector.broadcast %cst_76 : f32 to vector<64x64xf32>
    %112 = arith.select %110, %111, %108 : vector<64x64xi1>, vector<64x64xf32>
    %c0_77 = arith.constant 0 : index
    %c0_78 = arith.constant 0 : index
    %c0_79 = arith.constant 0 : index
    %113 = vector.load %arg17[%c0_77, %c0_78, %c0_79] : memref<1x64x64xf32, #tpu.memory_space<vmem>>, vector<1x64x64xf32>
    %114 = vector.shape_cast %113 : vector<1x64x64xf32> to vector<64x64xf32>
    %115 = vector.shape_cast %112 : vector<64x64xf32> to vector<1x64x64xf32>
    tpu.vector_store %arg17[%c0_77, %c0_78, %c0_79], %115 {strides = array<i32>} : memref<1x64x64xf32, #tpu.memory_space<vmem>>, vector<1x64x64xf32>,
    %116 = arith.extui %110 : vector<64x64xi1> to vector<64x64xi32>
    %117 = arith.sitofp %116 : vector<64x64xi32> to vector<64x64xf32>
    %118 = arith.truncf %117 : vector<64x64xf32> to vector<64x64xbf16>
    %cst_80 = arith.constant dense<0.000000e+00> : vector<16x64xf32>
    %119 = tpu.matmul %9, %118, %cst_80 {dimension_numbers = #tpu.dot_dimension_numbers<[1], [0], [0], [1], [0, 0, 1, 1], [], []>} : vector<16x64xbf16>, vector<64x64xbf16>, vector<16x64xf32> -> vector<16x64xf32>
    %120 = vector.broadcast %10 : vector<16x1xf32> to vector<16x64xf32>
    %121 = arith.addf %119, %120 : vector<16x64xf32>
    %c0_81 = arith.constant 0 : index
    %c0_82 = arith.constant 0 : index
    %c0_83 = arith.constant 0 : index
    %c0_84 = arith.constant 0 : index
    %122 = vector.load %arg11[%c0_81, %c0_82, %c0_83, %c0_84] : memref<1x1x16x64xf32, #tpu.memory_space<vmem>>, vector<1x1x16x64xf32>
    %123 = vector.shape_cast %122 : vector<1x1x16x64xf32> to vector<16x64xf32>
    %124 = arith.addf %123, %121 : vector<16x64xf32>
    %c0_85 = arith.constant 0 : index
    %c0_86 = arith.constant 0 : index
    %c0_87 = arith.constant 0 : index
    %c0_88 = arith.constant 0 : index
    %125 = vector.load %arg11[%c0_85, %c0_86, %c0_87, %c0_88] : memref<1x1x16x64xf32, #tpu.memory_space<vmem>>, vector<1x1x16x64xf32>
    %126 = vector.shape_cast %125 : vector<1x1x16x64xf32> to vector<16x64xf32>
    %127 = vector.shape_cast %124 : vector<16x64xf32> to vector<1x1x16x64xf32>
    tpu.vector_store %arg11[%c0_85, %c0_86, %c0_87, %c0_88], %127 {strides = array<i32>} : memref<1x1x16x64xf32, #tpu.memory_space<vmem>>, vector<1x1x16x64xf32>,
    return
  }
  func.func @transform_0(%arg0: i32, %arg1: i32) -> (i32, i32, i32, i32) {
    %c0_i32 = arith.constant 0 : i32
    %c0_i32_0 = arith.constant 0 : i32
    %c0_i32_1 = arith.constant 0 : i32
    return %arg1, %arg0, %c0_i32, %c0_i32_0 : i32, i32, i32, i32
  }
  func.func @transform_1(%arg0: i32, %arg1: i32) -> (i32, i32) {
    %c0_i32 = arith.constant 0 : i32
    %c0_i32_0 = arith.constant 0 : i32
    %c0_i32_1 = arith.constant 0 : i32
    return %c0_i32, %c0_i32_0 : i32, i32
  }
  func.func @transform_2(%arg0: i32, %arg1: i32) -> (i32, i32) {
    %c0_i32 = arith.constant 0 : i32
    %c0_i32_0 = arith.constant 0 : i32
    %c0_i32_1 = arith.constant 0 : i32
    return %c0_i32, %c0_i32_0 : i32, i32
  }
  func.func @transform_3(%arg0: i32, %arg1: i32) -> (i32, i32) {
    %c0_i32 = arith.constant 0 : i32
    %c0_i32_0 = arith.constant 0 : i32
    %c0_i32_1 = arith.constant 0 : i32
    return %c0_i32, %c0_i32_0 : i32, i32
  }
  func.func @transform_4(%arg0: i32, %arg1: i32) -> (i32, i32) {
    %c0_i32 = arith.constant 0 : i32
    %c0_i32_0 = arith.constant 0 : i32
    %c0_i32_1 = arith.constant 0 : i32
    return %c0_i32, %c0_i32_0 : i32, i32
  }
  func.func @transform_5(%arg0: i32, %arg1: i32) -> (i32, i32) {
    %c0_i32 = arith.constant 0 : i32
    %c0_i32_0 = arith.constant 0 : i32
    %c0_i32_1 = arith.constant 0 : i32
    return %c0_i32, %c0_i32_0 : i32, i32
  }
  func.func @transform_6(%arg0: i32, %arg1: i32) -> (i32, i32) {
    %c0_i32 = arith.constant 0 : i32
    %c0_i32_0 = arith.constant 0 : i32
    %c0_i32_1 = arith.constant 0 : i32
    return %c0_i32, %c0_i32_0 : i32, i32
  }
  func.func @transform_7(%arg0: i32, %arg1: i32) -> (i32, i32) {
    %c0_i32 = arith.constant 0 : i32
    %c0_i32_0 = arith.constant 0 : i32
    %c0_i32_1 = arith.constant 0 : i32
    return %c0_i32, %c0_i32_0 : i32, i32
  }
  func.func @transform_8(%arg0: i32, %arg1: i32) -> (i32, i32) {
    %c0_i32 = arith.constant 0 : i32
    %c0_i32_0 = arith.constant 0 : i32
    %c0_i32_1 = arith.constant 0 : i32
    return %c0_i32, %c0_i32_0 : i32, i32
  }
  func.func @transform_9(%arg0: i32, %arg1: i32) -> (i32, i32, i32, i32) {
    %c0_i32 = arith.constant 0 : i32
    %c0_i32_0 = arith.constant 0 : i32
    %c0_i32_1 = arith.constant 0 : i32
    return %arg1, %arg0, %c0_i32, %c0_i32_0 : i32, i32, i32, i32
  }
  func.func @transform_10(%arg0: i32, %arg1: i32) -> (i32, i32, i32, i32) {
    %c0_i32 = arith.constant 0 : i32
    %c0_i32_0 = arith.constant 0 : i32
    %c0_i32_1 = arith.constant 0 : i32
    return %arg1, %arg0, %c0_i32, %c0_i32_0 : i32, i32, i32, i32
  }
}

module attributes {stable_mosaic.version = 11 : i64} {
  func.func @ms_block_kernel(%arg0: i32, %arg1: i32, %arg2: memref<1x1x16x64xf32, #tpu.memory_space<vmem>>, %arg3: memref<48x16xbf16, #tpu.memory_space<vmem>>, %arg4: memref<48x1xf32, #tpu.memory_space<vmem>>, %arg5: memref<16x16xbf16, #tpu.memory_space<vmem>>, %arg6: memref<16x1xf32, #tpu.memory_space<vmem>>, %arg7: memref<64x16xbf16, #tpu.memory_space<vmem>>, %arg8: memref<64x1xf32, #tpu.memory_space<vmem>>, %arg9: memref<16x64xbf16, #tpu.memory_space<vmem>>, %arg10: memref<16x1xf32, #tpu.memory_space<vmem>>, %arg11: memref<1x1x16x64xf32, #tpu.memory_space<vmem>>, %arg12: memref<1x1x16x64xbf16, #tpu.memory_space<vmem>>, %arg13: memref<1x16x64xf32, #tpu.memory_space<vmem>>, %arg14: memref<1x48x64xf32, #tpu.memory_space<vmem>>, %arg15: memref<1x16x1xf32, #tpu.memory_space<vmem>>, %arg16: memref<1x16x64xf32, #tpu.memory_space<vmem>>, %arg17: memref<1x64x64xf32, #tpu.memory_space<vmem>>) attributes {dimension_semantics = [#tpu.dimension_semantics<parallel>, #tpu.dimension_semantics<arbitrary>], iteration_bounds = array<i64: 2, 2>, scalar_prefetch = 0 : i64, scratch_operands = 5 : i64, tpu.core_type = #tpu.core_type<tc>, window_params = [{transform_indices = @transform_0, window_bounds = array<i64: 1, 1, 16, 64>}, {pipeline_mode = #tpu.pipeline_mode<synchronous>, transform_indices = @transform_1, window_bounds = array<i64: 48, 16>}, {pipeline_mode = #tpu.pipeline_mode<synchronous>, transform_indices = @transform_2, window_bounds = array<i64: 48, 1>}, {pipeline_mode = #tpu.pipeline_mode<synchronous>, transform_indices = @transform_3, window_bounds = array<i64: 16, 16>}, {pipeline_mode = #tpu.pipeline_mode<synchronous>, transform_indices = @transform_4, window_bounds = array<i64: 16, 1>}, {pipeline_mode = #tpu.pipeline_mode<synchronous>, transform_indices = @transform_5, window_bounds = array<i64: 64, 16>}, {pipeline_mode = #tpu.pipeline_mode<synchronous>, transform_indices = @transform_6, window_bounds = array<i64: 64, 1>}, {pipeline_mode = #tpu.pipeline_mode<synchronous>, transform_indices = @transform_7, window_bounds = array<i64: 16, 64>}, {pipeline_mode = #tpu.pipeline_mode<synchronous>, transform_indices = @transform_8, window_bounds = array<i64: 16, 1>}, {transform_indices = @transform_9, window_bounds = array<i64: 1, 1, 16, 64>}, {transform_indices = @transform_10, window_bounds = array<i64: 1, 1, 16, 64>}]} {
    %c0_i32 = arith.constant 0 : i32
    %0 = arith.cmpi eq, %arg1, %c0_i32 : i32
    %1 = arith.extui %0 : i1 to i32
    %c0_i32_0 = arith.constant 0 : i32
    %2 = arith.cmpi ne, %1, %c0_i32_0 : i32
    scf.if %2 {
      %cst_89 = arith.constant 0.000000e+00 : f32
      %128 = vector.broadcast %cst_89 : f32 to vector<1x16x64xf32>
      %c0_90 = arith.constant 0 : index
      %c0_91 = arith.constant 0 : index
      %c0_92 = arith.constant 0 : index
      %129 = vector.load %arg13[%c0_90, %c0_91, %c0_92] : memref<1x16x64xf32, #tpu.memory_space<vmem>>, vector<1x16x64xf32>
      tpu.vector_store %arg13[%c0_90, %c0_91, %c0_92], %128 {strides = array<i32>} : memref<1x16x64xf32, #tpu.memory_space<vmem>>, vector<1x16x64xf32>,
      %cst_93 = arith.constant 0.000000e+00 : f32
      %130 = vector.broadcast %cst_93 : f32 to vector<1x48x64xf32>
      %c0_94 = arith.constant 0 : index
      %c0_95 = arith.constant 0 : index
      %c0_96 = arith.constant 0 : index
      %131 = vector.load %arg14[%c0_94, %c0_95, %c0_96] : memref<1x48x64xf32, #tpu.memory_space<vmem>>, vector<1x48x64xf32>
      tpu.vector_store %arg14[%c0_94, %c0_95, %c0_96], %130 {strides = array<i32>} : memref<1x48x64xf32, #tpu.memory_space<vmem>>, vector<1x48x64xf32>,
      %cst_97 = arith.constant 0.000000e+00 : f32
      %132 = vector.broadcast %cst_97 : f32 to vector<1x16x1xf32>
      %c0_98 = arith.constant 0 : index
      %c0_99 = arith.constant 0 : index
      %c0_100 = arith.constant 0 : index
      %133 = vector.load %arg15[%c0_98, %c0_99, %c0_100] : memref<1x16x1xf32, #tpu.memory_space<vmem>>, vector<1x16x1xf32>
      tpu.vector_store %arg15[%c0_98, %c0_99, %c0_100], %132 {strides = array<i32>} : memref<1x16x1xf32, #tpu.memory_space<vmem>>, vector<1x16x1xf32>,
      %cst_101 = arith.constant 0.000000e+00 : f32
      %134 = vector.broadcast %cst_101 : f32 to vector<1x16x64xf32>
      %c0_102 = arith.constant 0 : index
      %c0_103 = arith.constant 0 : index
      %c0_104 = arith.constant 0 : index
      %135 = vector.load %arg16[%c0_102, %c0_103, %c0_104] : memref<1x16x64xf32, #tpu.memory_space<vmem>>, vector<1x16x64xf32>
      tpu.vector_store %arg16[%c0_102, %c0_103, %c0_104], %134 {strides = array<i32>} : memref<1x16x64xf32, #tpu.memory_space<vmem>>, vector<1x16x64xf32>,
      %cst_105 = arith.constant 0.000000e+00 : f32
      %136 = vector.broadcast %cst_105 : f32 to vector<1x64x64xf32>
      %c0_106 = arith.constant 0 : index
      %c0_107 = arith.constant 0 : index
      %c0_108 = arith.constant 0 : index
      %137 = vector.load %arg17[%c0_106, %c0_107, %c0_108] : memref<1x64x64xf32, #tpu.memory_space<vmem>>, vector<1x64x64xf32>
      tpu.vector_store %arg17[%c0_106, %c0_107, %c0_108], %136 {strides = array<i32>} : memref<1x64x64xf32, #tpu.memory_space<vmem>>, vector<1x64x64xf32>,
    } else {
    }
    %c0 = arith.constant 0 : index
    %c0_1 = arith.constant 0 : index
    %3 = vector.load %arg3[%c0, %c0_1] : memref<48x16xbf16, #tpu.memory_space<vmem>>, vector<48x16xbf16>
    %c0_2 = arith.constant 0 : index
    %c0_3 = arith.constant 0 : index
    %4 = vector.load %arg4[%c0_2, %c0_3] : memref<48x1xf32, #tpu.memory_space<vmem>>, vector<48x1xf32>
    %c0_4 = arith.constant 0 : index
    %c0_5 = arith.constant 0 : index
    %5 = vector.load %arg5[%c0_4, %c0_5] : memref<16x16xbf16, #tpu.memory_space<vmem>>, vector<16x16xbf16>
    %c0_6 = arith.constant 0 : index
    %c0_7 = arith.constant 0 : index
    %6 = vector.load %arg6[%c0_6, %c0_7] : memref<16x1xf32, #tpu.memory_space<vmem>>, vector<16x1xf32>
    %c0_8 = arith.constant 0 : index
    %c0_9 = arith.constant 0 : index
    %7 = vector.load %arg7[%c0_8, %c0_9] : memref<64x16xbf16, #tpu.memory_space<vmem>>, vector<64x16xbf16>
    %c0_10 = arith.constant 0 : index
    %c0_11 = arith.constant 0 : index
    %8 = vector.load %arg8[%c0_10, %c0_11] : memref<64x1xf32, #tpu.memory_space<vmem>>, vector<64x1xf32>
    %c0_12 = arith.constant 0 : index
    %c0_13 = arith.constant 0 : index
    %9 = vector.load %arg9[%c0_12, %c0_13] : memref<16x64xbf16, #tpu.memory_space<vmem>>, vector<16x64xbf16>
    %c0_14 = arith.constant 0 : index
    %c0_15 = arith.constant 0 : index
    %10 = vector.load %arg10[%c0_14, %c0_15] : memref<16x1xf32, #tpu.memory_space<vmem>>, vector<16x1xf32>
    %c0_16 = arith.constant 0 : index
    %c0_17 = arith.constant 0 : index
    %c0_18 = arith.constant 0 : index
    %c0_19 = arith.constant 0 : index
    %11 = vector.load %arg2[%c0_16, %c0_17, %c0_18, %c0_19] : memref<1x1x16x64xf32, #tpu.memory_space<vmem>>, vector<1x1x16x64xf32>
    %12 = vector.shape_cast %11 : vector<1x1x16x64xf32> to vector<16x64xf32>
    %c0_20 = arith.constant 0 : index
    %c0_21 = arith.constant 0 : index
    %c0_22 = arith.constant 0 : index
    %13 = vector.load %arg13[%c0_20, %c0_21, %c0_22] : memref<1x16x64xf32, #tpu.memory_space<vmem>>, vector<1x16x64xf32>
    %14 = vector.shape_cast %13 : vector<1x16x64xf32> to vector<16x64xf32>
    %15 = arith.subf %12, %14 : vector<16x64xf32>
    %cst = arith.constant 5.000000e-01 : f32
    %16 = vector.broadcast %cst : f32 to vector<16x64xf32>
    %17 = arith.mulf %15, %16 : vector<16x64xf32>
    %18 = arith.addf %14, %17 : vector<16x64xf32>
    %cst_23 = arith.constant 1.000000e+00 : f32
    %19 = vector.broadcast %cst_23 : f32 to vector<16x64xf32>
    %20 = arith.cmpf oge, %18, %19 : vector<16x64xf32>
    %cst_24 = arith.constant 0.000000e+00 : f32
    %21 = vector.broadcast %cst_24 : f32 to vector<16x64xf32>
    %22 = arith.select %20, %21, %18 : vector<16x64xi1>, vector<16x64xf32>
    %c0_25 = arith.constant 0 : index
    %c0_26 = arith.constant 0 : index
    %c0_27 = arith.constant 0 : index
    %23 = vector.load %arg13[%c0_25, %c0_26, %c0_27] : memref<1x16x64xf32, #tpu.memory_space<vmem>>, vector<1x16x64xf32>
    %24 = vector.shape_cast %23 : vector<1x16x64xf32> to vector<16x64xf32>
    %25 = vector.shape_cast %22 : vector<16x64xf32> to vector<1x16x64xf32>
    tpu.vector_store %arg13[%c0_25, %c0_26, %c0_27], %25 {strides = array<i32>} : memref<1x16x64xf32, #tpu.memory_space<vmem>>, vector<1x16x64xf32>,
    %26 = arith.extui %20 : vector<16x64xi1> to vector<16x64xi32>
    %27 = arith.sitofp %26 : vector<16x64xi32> to vector<16x64xf32>
    %28 = arith.truncf %27 : vector<16x64xf32> to vector<16x64xbf16>
    %cst_28 = arith.constant dense<0.000000e+00> : vector<48x64xf32>
    %29 = tpu.matmul %3, %28, %cst_28 {dimension_numbers = #tpu.dot_dimension_numbers<[1], [0], [0], [1], [0, 0, 1, 1], [], []>} : vector<48x16xbf16>, vector<16x64xbf16>, vector<48x64xf32> -> vector<48x64xf32>
    %30 = vector.broadcast %4 : vector<48x1xf32> to vector<48x64xf32>
    %31 = arith.addf %29, %30 : vector<48x64xf32>
    %c0_29 = arith.constant 0 : index
    %c0_30 = arith.constant 0 : index
    %c0_31 = arith.constant 0 : index
    %32 = vector.load %arg14[%c0_29, %c0_30, %c0_31] : memref<1x48x64xf32, #tpu.memory_space<vmem>>, vector<1x48x64xf32>
    %33 = vector.shape_cast %32 : vector<1x48x64xf32> to vector<48x64xf32>
    %34 = arith.subf %31, %33 : vector<48x64xf32>
    %cst_32 = arith.constant 5.000000e-01 : f32
    %35 = vector.broadcast %cst_32 : f32 to vector<48x64xf32>
    %36 = arith.mulf %34, %35 : vector<48x64xf32>
    %37 = arith.addf %33, %36 : vector<48x64xf32>
    %cst_33 = arith.constant 1.000000e+00 : f32
    %38 = vector.broadcast %cst_33 : f32 to vector<48x64xf32>
    %39 = arith.cmpf oge, %37, %38 : vector<48x64xf32>
    %cst_34 = arith.constant 0.000000e+00 : f32
    %40 = vector.broadcast %cst_34 : f32 to vector<48x64xf32>
    %41 = arith.select %39, %40, %37 : vector<48x64xi1>, vector<48x64xf32>
    %c0_35 = arith.constant 0 : index
    %c0_36 = arith.constant 0 : index
    %c0_37 = arith.constant 0 : index
    %42 = vector.load %arg14[%c0_35, %c0_36, %c0_37] : memref<1x48x64xf32, #tpu.memory_space<vmem>>, vector<1x48x64xf32>
    %43 = vector.shape_cast %42 : vector<1x48x64xf32> to vector<48x64xf32>
    %44 = vector.shape_cast %41 : vector<48x64xf32> to vector<1x48x64xf32>
    tpu.vector_store %arg14[%c0_35, %c0_36, %c0_37], %44 {strides = array<i32>} : memref<1x48x64xf32, #tpu.memory_space<vmem>>, vector<1x48x64xf32>,
    %45 = arith.extui %39 : vector<48x64xi1> to vector<48x64xi32>
    %46 = arith.sitofp %45 : vector<48x64xi32> to vector<48x64xf32>
    %47 = vector.extract_strided_slice %46 {offsets = [0, 0], sizes = [16, 64], strides = [1, 1]} : vector<48x64xf32> to vector<16x64xf32>
    %48 = vector.extract_strided_slice %46 {offsets = [16, 0], sizes = [16, 64], strides = [1, 1]} : vector<48x64xf32> to vector<16x64xf32>
    %49 = vector.extract_strided_slice %46 {offsets = [32, 0], sizes = [16, 64], strides = [1, 1]} : vector<48x64xf32> to vector<16x64xf32>
    %50 = arith.truncf %49 : vector<16x64xf32> to vector<16x64xbf16>
    %c0_38 = arith.constant 0 : index
    %c0_39 = arith.constant 0 : index
    %c0_40 = arith.constant 0 : index
    %c0_41 = arith.constant 0 : index
    %51 = vector.load %arg12[%c0_38, %c0_39, %c0_40, %c0_41] : memref<1x1x16x64xbf16, #tpu.memory_space<vmem>>, vector<1x1x16x64xbf16>
    %52 = vector.shape_cast %51 : vector<1x1x16x64xbf16> to vector<16x64xbf16>
    %53 = vector.shape_cast %50 : vector<16x64xbf16> to vector<1x1x16x64xbf16>
    tpu.vector_store %arg12[%c0_38, %c0_39, %c0_40, %c0_41], %53 {strides = array<i32>} : memref<1x1x16x64xbf16, #tpu.memory_space<vmem>>, vector<1x1x16x64xbf16>,
    %54 = arith.mulf %48, %49 : vector<16x64xf32>
    %cst_42 = arith.constant dense<0.000000e+00> : vector<16xf32>
    %55 = vector.multi_reduction <add>, %54, %cst_42 [1] : vector<16x64xf32> to vector<16xf32>
    %56 = vector.shape_cast %55 : vector<16xf32> to vector<16x1xf32>
    %c0_43 = arith.constant 0 : index
    %c0_44 = arith.constant 0 : index
    %c0_45 = arith.constant 0 : index
    %57 = vector.load %arg15[%c0_43, %c0_44, %c0_45] : memref<1x16x1xf32, #tpu.memory_space<vmem>>, vector<1x16x1xf32>
    %58 = vector.shape_cast %57 : vector<1x16x1xf32> to vector<16x1xf32>
    %59 = arith.subf %56, %58 : vector<16x1xf32>
    %cst_46 = arith.constant 5.000000e-01 : f32
    %60 = vector.broadcast %cst_46 : f32 to vector<16x1xf32>
    %61 = arith.mulf %59, %60 : vector<16x1xf32>
    %62 = arith.addf %58, %61 : vector<16x1xf32>
    %cst_47 = arith.constant 5.000000e-01 : f32
    %63 = vector.broadcast %cst_47 : f32 to vector<16x1xf32>
    %64 = arith.cmpf oge, %62, %63 : vector<16x1xf32>
    %cst_48 = arith.constant 0.000000e+00 : f32
    %65 = vector.broadcast %cst_48 : f32 to vector<16x1xf32>
    %66 = arith.select %64, %65, %62 : vector<16x1xi1>, vector<16x1xf32>
    %c0_49 = arith.constant 0 : index
    %c0_50 = arith.constant 0 : index
    %c0_51 = arith.constant 0 : index
    %67 = vector.load %arg15[%c0_49, %c0_50, %c0_51] : memref<1x16x1xf32, #tpu.memory_space<vmem>>, vector<1x16x1xf32>
    %68 = vector.shape_cast %67 : vector<1x16x1xf32> to vector<16x1xf32>
    %69 = vector.shape_cast %66 : vector<16x1xf32> to vector<1x16x1xf32>
    tpu.vector_store %arg15[%c0_49, %c0_50, %c0_51], %69 {strides = array<i32>} : memref<1x16x1xf32, #tpu.memory_space<vmem>>, vector<1x16x1xf32>,
    %70 = arith.extui %64 : vector<16x1xi1> to vector<16x1xi32>
    %71 = arith.sitofp %70 : vector<16x1xi32> to vector<16x1xf32>
    %72 = vector.broadcast %71 : vector<16x1xf32> to vector<16x64xf32>
    %73 = arith.mulf %47, %72 : vector<16x64xf32>
    %74 = arith.truncf %73 : vector<16x64xf32> to vector<16x64xbf16>
    %cst_52 = arith.constant dense<0.000000e+00> : vector<16x64xf32>
    %75 = tpu.matmul %5, %74, %cst_52 {dimension_numbers = #tpu.dot_dimension_numbers<[1], [0], [0], [1], [0, 0, 1, 1], [], []>} : vector<16x16xbf16>, vector<16x64xbf16>, vector<16x64xf32> -> vector<16x64xf32>
    %76 = vector.broadcast %6 : vector<16x1xf32> to vector<16x64xf32>
    %77 = arith.addf %75, %76 : vector<16x64xf32>
    %c0_53 = arith.constant 0 : index
    %c0_54 = arith.constant 0 : index
    %c0_55 = arith.constant 0 : index
    %c0_56 = arith.constant 0 : index
    %78 = vector.load %arg2[%c0_53, %c0_54, %c0_55, %c0_56] : memref<1x1x16x64xf32, #tpu.memory_space<vmem>>, vector<1x1x16x64xf32>
    %79 = vector.shape_cast %78 : vector<1x1x16x64xf32> to vector<16x64xf32>
    %80 = arith.addf %77, %79 : vector<16x64xf32>
    %c0_57 = arith.constant 0 : index
    %c0_58 = arith.constant 0 : index
    %c0_59 = arith.constant 0 : index
    %c0_60 = arith.constant 0 : index
    %81 = vector.load %arg11[%c0_57, %c0_58, %c0_59, %c0_60] : memref<1x1x16x64xf32, #tpu.memory_space<vmem>>, vector<1x1x16x64xf32>
    %82 = vector.shape_cast %81 : vector<1x1x16x64xf32> to vector<16x64xf32>
    %83 = vector.shape_cast %80 : vector<16x64xf32> to vector<1x1x16x64xf32>
    tpu.vector_store %arg11[%c0_57, %c0_58, %c0_59, %c0_60], %83 {strides = array<i32>} : memref<1x1x16x64xf32, #tpu.memory_space<vmem>>, vector<1x1x16x64xf32>,
    %c0_61 = arith.constant 0 : index
    %c0_62 = arith.constant 0 : index
    %c0_63 = arith.constant 0 : index
    %84 = vector.load %arg16[%c0_61, %c0_62, %c0_63] : memref<1x16x64xf32, #tpu.memory_space<vmem>>, vector<1x16x64xf32>
    %85 = vector.shape_cast %84 : vector<1x16x64xf32> to vector<16x64xf32>
    %86 = arith.subf %80, %85 : vector<16x64xf32>
    %cst_64 = arith.constant 5.000000e-01 : f32
    %87 = vector.broadcast %cst_64 : f32 to vector<16x64xf32>
    %88 = arith.mulf %86, %87 : vector<16x64xf32>
    %89 = arith.addf %85, %88 : vector<16x64xf32>
    %cst_65 = arith.constant 1.000000e+00 : f32
    %90 = vector.broadcast %cst_65 : f32 to vector<16x64xf32>
    %91 = arith.cmpf oge, %89, %90 : vector<16x64xf32>
    %cst_66 = arith.constant 0.000000e+00 : f32
    %92 = vector.broadcast %cst_66 : f32 to vector<16x64xf32>
    %93 = arith.select %91, %92, %89 : vector<16x64xi1>, vector<16x64xf32>
    %c0_67 = arith.constant 0 : index
    %c0_68 = arith.constant 0 : index
    %c0_69 = arith.constant 0 : index
    %94 = vector.load %arg16[%c0_67, %c0_68, %c0_69] : memref<1x16x64xf32, #tpu.memory_space<vmem>>, vector<1x16x64xf32>
    %95 = vector.shape_cast %94 : vector<1x16x64xf32> to vector<16x64xf32>
    %96 = vector.shape_cast %93 : vector<16x64xf32> to vector<1x16x64xf32>
    tpu.vector_store %arg16[%c0_67, %c0_68, %c0_69], %96 {strides = array<i32>} : memref<1x16x64xf32, #tpu.memory_space<vmem>>, vector<1x16x64xf32>,
    %97 = arith.extui %91 : vector<16x64xi1> to vector<16x64xi32>
    %98 = arith.sitofp %97 : vector<16x64xi32> to vector<16x64xf32>
    %99 = arith.truncf %98 : vector<16x64xf32> to vector<16x64xbf16>
    %cst_70 = arith.constant dense<0.000000e+00> : vector<64x64xf32>
    %100 = tpu.matmul %7, %99, %cst_70 {dimension_numbers = #tpu.dot_dimension_numbers<[1], [0], [0], [1], [0, 0, 1, 1], [], []>} : vector<64x16xbf16>, vector<16x64xbf16>, vector<64x64xf32> -> vector<64x64xf32>
    %101 = vector.broadcast %8 : vector<64x1xf32> to vector<64x64xf32>
    %102 = arith.addf %100, %101 : vector<64x64xf32>
    %c0_71 = arith.constant 0 : index
    %c0_72 = arith.constant 0 : index
    %c0_73 = arith.constant 0 : index
    %103 = vector.load %arg17[%c0_71, %c0_72, %c0_73] : memref<1x64x64xf32, #tpu.memory_space<vmem>>, vector<1x64x64xf32>
    %104 = vector.shape_cast %103 : vector<1x64x64xf32> to vector<64x64xf32>
    %105 = arith.subf %102, %104 : vector<64x64xf32>
    %cst_74 = arith.constant 5.000000e-01 : f32
    %106 = vector.broadcast %cst_74 : f32 to vector<64x64xf32>
    %107 = arith.mulf %105, %106 : vector<64x64xf32>
    %108 = arith.addf %104, %107 : vector<64x64xf32>
    %cst_75 = arith.constant 1.000000e+00 : f32
    %109 = vector.broadcast %cst_75 : f32 to vector<64x64xf32>
    %110 = arith.cmpf oge, %108, %109 : vector<64x64xf32>
    %cst_76 = arith.constant 0.000000e+00 : f32
    %111 = vector.broadcast %cst_76 : f32 to vector<64x64xf32>
    %112 = arith.select %110, %111, %108 : vector<64x64xi1>, vector<64x64xf32>
    %c0_77 = arith.constant 0 : index
    %c0_78 = arith.constant 0 : index
    %c0_79 = arith.constant 0 : index
    %113 = vector.load %arg17[%c0_77, %c0_78, %c0_79] : memref<1x64x64xf32, #tpu.memory_space<vmem>>, vector<1x64x64xf32>
    %114 = vector.shape_cast %113 : vector<1x64x64xf32> to vector<64x64xf32>
    %115 = vector.shape_cast %112 : vector<64x64xf32> to vector<1x64x64xf32>
    tpu.vector_store %arg17[%c0_77, %c0_78, %c0_79], %115 {strides = array<i32>} : memref<1x64x64xf32, #tpu.memory_space<vmem>>, vector<1x64x64xf32>,
    %116 = arith.extui %110 : vector<64x64xi1> to vector<64x64xi32>
    %117 = arith.sitofp %116 : vector<64x64xi32> to vector<64x64xf32>
    %118 = arith.truncf %117 : vector<64x64xf32> to vector<64x64xbf16>
    %cst_80 = arith.constant dense<0.000000e+00> : vector<16x64xf32>
    %119 = tpu.matmul %9, %118, %cst_80 {dimension_numbers = #tpu.dot_dimension_numbers<[1], [0], [0], [1], [0, 0, 1, 1], [], []>} : vector<16x64xbf16>, vector<64x64xbf16>, vector<16x64xf32> -> vector<16x64xf32>
    %120 = vector.broadcast %10 : vector<16x1xf32> to vector<16x64xf32>
    %121 = arith.addf %119, %120 : vector<16x64xf32>
    %c0_81 = arith.constant 0 : index
    %c0_82 = arith.constant 0 : index
    %c0_83 = arith.constant 0 : index
    %c0_84 = arith.constant 0 : index
    %122 = vector.load %arg11[%c0_81, %c0_82, %c0_83, %c0_84] : memref<1x1x16x64xf32, #tpu.memory_space<vmem>>, vector<1x1x16x64xf32>
    %123 = vector.shape_cast %122 : vector<1x1x16x64xf32> to vector<16x64xf32>
    %124 = arith.addf %123, %121 : vector<16x64xf32>
    %c0_85 = arith.constant 0 : index
    %c0_86 = arith.constant 0 : index
    %c0_87 = arith.constant 0 : index
    %c0_88 = arith.constant 0 : index
    %125 = vector.load %arg11[%c0_85, %c0_86, %c0_87, %c0_88] : memref<1x1x16x64xf32, #tpu.memory_space<vmem>>, vector<1x1x16x64xf32>
    %126 = vector.shape_cast %125 : vector<1x1x16x64xf32> to vector<16x64xf32>
    %127 = vector.shape_cast %124 : vector<16x64xf32> to vector<1x1x16x64xf32>
    tpu.vector_store %arg11[%c0_85, %c0_86, %c0_87, %c0_88], %127 {strides = array<i32>} : memref<1x1x16x64xf32, #tpu.memory_space<vmem>>, vector<1x1x16x64xf32>,
    return
  }
  func.func @transform_0(%arg0: i32, %arg1: i32) -> (i32, i32, i32, i32) {
    %c0_i32 = arith.constant 0 : i32
    %c0_i32_0 = arith.constant 0 : i32
    %c0_i32_1 = arith.constant 0 : i32
    return %arg1, %arg0, %c0_i32, %c0_i32_0 : i32, i32, i32, i32
  }
  func.func @transform_1(%arg0: i32, %arg1: i32) -> (i32, i32) {
    %c0_i32 = arith.constant 0 : i32
    %c0_i32_0 = arith.constant 0 : i32
    %c0_i32_1 = arith.constant 0 : i32
    return %c0_i32, %c0_i32_0 : i32, i32
  }
  func.func @transform_2(%arg0: i32, %arg1: i32) -> (i32, i32) {
    %c0_i32 = arith.constant 0 : i32
    %c0_i32_0 = arith.constant 0 : i32
    %c0_i32_1 = arith.constant 0 : i32
    return %c0_i32, %c0_i32_0 : i32, i32
  }
  func.func @transform_3(%arg0: i32, %arg1: i32) -> (i32, i32) {
    %c0_i32 = arith.constant 0 : i32
    %c0_i32_0 = arith.constant 0 : i32
    %c0_i32_1 = arith.constant 0 : i32
    return %c0_i32, %c0_i32_0 : i32, i32
  }
  func.func @transform_4(%arg0: i32, %arg1: i32) -> (i32, i32) {
    %c0_i32 = arith.constant 0 : i32
    %c0_i32_0 = arith.constant 0 : i32
    %c0_i32_1 = arith.constant 0 : i32
    return %c0_i32, %c0_i32_0 : i32, i32
  }
  func.func @transform_5(%arg0: i32, %arg1: i32) -> (i32, i32) {
    %c0_i32 = arith.constant 0 : i32
    %c0_i32_0 = arith.constant 0 : i32
    %c0_i32_1 = arith.constant 0 : i32
    return %c0_i32, %c0_i32_0 : i32, i32
  }
  func.func @transform_6(%arg0: i32, %arg1: i32) -> (i32, i32) {
    %c0_i32 = arith.constant 0 : i32
    %c0_i32_0 = arith.constant 0 : i32
    %c0_i32_1 = arith.constant 0 : i32
    return %c0_i32, %c0_i32_0 : i32, i32
  }
  func.func @transform_7(%arg0: i32, %arg1: i32) -> (i32, i32) {
    %c0_i32 = arith.constant 0 : i32
    %c0_i32_0 = arith.constant 0 : i32
    %c0_i32_1 = arith.constant 0 : i32
    return %c0_i32, %c0_i32_0 : i32, i32
  }
  func.func @transform_8(%arg0: i32, %arg1: i32) -> (i32, i32) {
    %c0_i32 = arith.constant 0 : i32
    %c0_i32_0 = arith.constant 0 : i32
    %c0_i32_1 = arith.constant 0 : i32
    return %c0_i32, %c0_i32_0 : i32, i32
  }
  func.func @transform_9(%arg0: i32, %arg1: i32) -> (i32, i32, i32, i32) {
    %c0_i32 = arith.constant 0 : i32
    %c0_i32_0 = arith.constant 0 : i32
    %c0_i32_1 = arith.constant 0 : i32
    return %arg1, %arg0, %c0_i32, %c0_i32_0 : i32, i32, i32, i32
  }
  func.func @transform_10(%arg0: i32, %arg1: i32) -> (i32, i32, i32, i32) {
    %c0_i32 = arith.constant 0 : i32
    %c0_i32_0 = arith.constant 0 : i32
    %c0_i32_1 = arith.constant 0 : i32
    return %arg1, %arg0, %c0_i32, %c0_i32_0 : i32, i32, i32, i32
  }
}

</mosaic_0001>

<bundles_post_ra>
// kernel: tpu_custom_call.1
= control target key start
LH: loop header
LB: loop body
LE: loop exit
PB: predicated region body
PF: predicated region fallthrough
CT: control target
= control target key end

     0   :  { %16 = vsyncpa [#allocation8], 0  ;;  %s2043_s0 = inlined_call_operand.vmem [shape: f32[2,2,16,64], index: 0, kind: input, shape index: {}]   ;;  %s2044_s1 = inlined_call_operand.vmem [shape: bf16[48,16], index: 1, kind: input, shape index: {}]   ;;  %s2045_s2 = inlined_call_operand.vmem [shape: f32[48,1], index: 2, kind: input, shape index: {}]   ;;  %s2046_s3 = inlined_call_operand.vmem [shape: bf16[16,16], index: 3, kind: input, shape index: {}]   ;;  %s2047_s4 = inlined_call_operand.vmem [shape: f32[16,1], index: 4, kind: input, shape index: {}]   ;;  %s2048_s5 = inlined_call_operand.vmem [shape: bf16[64,16], index: 5, kind: input, shape index: {}]   ;;  %s2049_s6 = inlined_call_operand.vmem [shape: f32[64,1], index: 6, kind: input, shape index: {}]   ;;  %s2050_s7 = inlined_call_operand.vmem [shape: bf16[16,64], index: 7, kind: input, shape index: {}]   ;;  %s2051_s8 = inlined_call_operand.vmem [shape: f32[16,1], index: 8, kind: input, shape index: {}]   ;;  %s2052_s9 = inlined_call_operand.hbm [shape: f32[2,2,16,64], index: 9, kind: output, shape index: {0}]   ;;  %s2053_s10 = inlined_call_operand.hbm [shape: bf16[2,2,16,64], index: 10, kind: output, shape index: {1}]  }
   0x1   :  { %18 = vsyncpa [#allocation8 + $0x1], 0 }
   0x2   :  { %19 = vsyncpa [#allocation10], 0 }
   0x3   :  { %21 = vsyncpa [#allocation10 + $0x1], 0  ;;  %s1646_s13 = smov 0   ;;  %s1648_s14 = smov 0  }
   0x4   :  { %s1650_s15 = smov 0   ;;  %s1652_s16 = smov 0  }
   0x5   :  { %s1654_s17 = smov 0   ;;  %s1656_s18 = smov 0  }
   0x6   :  { %s1658_s19 = smov 0   ;;  %s1660_s20 = smov 0  }
   0x7 LB: > { %2060 = sst [smem:[#allocation13_spill]] %s1554_s14  ;;  %s1222_s21 = sadd.s32 4294967295, %s1578_s20   ;;  %s1578_s20 = sphi %s1660_s20, %s27_s20   ;;  %s1574_s19 = sphi %s1658_s19, %s2075_s19   ;;  %s1570_s18 = sphi %s1656_s18, %s2074_s18   ;;  %s1566_s17 = sphi %s1654_s17, %s2073_s17   ;;  %s1562_s16 = sphi %s1652_s16, %s2072_s16   ;;  %s1558_s15 = sphi %s1650_s15, %s2071_s15   ;;  %s1554_s14 = sphi %s1648_s14, %s2070_s14   ;;  %s1550_s13 = sphi %s1646_s13, %s2069_s13  }
   0x8   : > { %2061 = sst [smem:[#allocation14_spill]] %s1558_s15  ;;  %s1223_s22 = sadd.s32 4294967294, %s1578_s20  }
   0x9   : > { %2062 = sst [smem:[#allocation15_spill]] %s1570_s18  ;;  %s36_s23 = sadd.s32 1, %s1570_s18 }
   0xa   : > { %2063 = sst [smem:[#allocation16_spill]] %s1574_s19  ;;  %p37_p0 = scmp.ge.s32.totalorder %s36_s23, 2 }
   0xb   : > { %s39_s24 = sadd.s32 1, %s1574_s19  ;;  %p254_p1 = scmp.ne.s32.totalorder %s1558_s15, %s1554_s14 }
   0xc   : > { %p255_p2 = scmp.eq.s32.totalorder %s1222_s21, 3  ;;  %s2077_s23 = smov (%p37_p0, %s36_s23), 0 }
   0xd   : > { %2064 = sst [smem:[#allocation17_spill]] %s2077_s23  ;;  %s2079_s24 = smov (!%p37_p0, %s39_s24), %s1574_s19 }
   0xe   : > { %s239_s25 = ssub.s32 %s1570_s18, %s2077_s23  ;;  %p1697_p3 = por %p255_p2, %p254_p1 }
   0xf   : > { %p41_p4 = scmp.ge.s32.totalorder %s2079_s24, 2  ;;  %p260_p5 = scmp.ne.s32.totalorder %s1554_s14, %s1550_s13 }
  0x10   : > { %p261_p6 = scmp.eq.s32.totalorder %s1223_s22, 3  ;;  %p1226_p7 = scmp.ge.s32.totalorder %s1578_s20, 1 }
  0x11   : > { %s2081_s24 = smov (%p41_p4, %s2079_s24), 0  ;;  %p343_p9 = scmp.lt.s32.totalorder %s1578_s20, 5 }
  0x12   : > { %2066 = sst [smem:[#allocation18_spill]] %s2081_s24  ;;  %p1706_p8 = por %p261_p6, %p260_p5 }
  0x13   : > { %s240_s28 = ssub.s32 %s1574_s19, %s2081_s24  ;;  %s244_s29 = sadd.s32 1, %s1558_s15 }
  0x14   : > { %s241_s30 = sor.u32 %s240_s28, %s239_s25  ;;  %p344_p10 = pnand %p1226_p7, %p343_p9 }
  0x15   : > { %p242_p11 = scmp.eq.s32.totalorder %s241_s30, 0  ;;  %s1718_s12 = sand.u32 (!%p344_p10), 1, %s1554_s14  }
  0x16   : > { %347 = sbr.rel (%p344_p10) target bundleno = 1225 (0x4c9), region = 56  ;;  %p390_p12 = scmp.lt.s32.totalorder (!%p344_p10), %s1562_s16, 1 }
  0x17   : > { %s1715_s11 = scalar_select %p242_p11, %s1558_s15, %s244_s29  }
  0x18   : > { %s1227_s21 = sshll.u32 (!%p344_p10), %s1718_s12, 4  ;;  %s1228_s22 = sshll.u32 (!%p344_p10), %s1718_s12, 3 }
  0x19   : > { %2068 = sst [smem:[#allocation19_spill]] %s1715_s11  ;;  %p392_p13 = scmp.lt.s32.totalorder (!%p344_p10), %s1566_s17, 1 }
  0x1a   : > { %s1729_s15 = scalar_lea.vmem (!%p344_p10), [#allocation7], %s1227_s21  ;;  %s1731_s14 = scalar_lea.vmem (!%p344_p10), [#allocation9], %s1228_s22 }
  0x1b   : > { %s391_s24 = scalar_select %p390_p12, %s1562_s16, 1 }
  0x1c   : > { %s393_s28 = scalar_select %p392_p13, %s1566_s17, 1 }
  0x1d   : > { %s1230_s25 = sshll.u32 %s391_s24, 2  ;;  %p1232_p0 = scmp.ne.s32.totalorder %s1562_s16, 0 }
  0x1e   : > { %s1229_s30 = sshll.u32 %s393_s28, 1 }
  0x1f   : > { %s396_s29 = sadd.s32 %s1230_s25, %s1229_s30  ;;  %403 = sbr.rel (%p1232_p0) target bundleno = 47 (0x2f), region = 60 }
  0x20   : > { %s1231_s23 = sshll.u32 %s396_s29, 3 }
  0x21   : > { %s398_s11 = scalar_lea.vmem %s2043_s0, %s1231_s23 }
  0x24   : > { %vm404_vm0 = vcmask 523264   ;;  %vm413_vm1 = vcmask 7168   ;;  %v1580_v0 = vmov 0.0  }
  0x25   : > { %405 = vst.msk [vmem:[#allocation2] sm:$0xff] %vm404_vm0, %v1580_v0  ;;  %406 = vst.msk [vmem:[#allocation2 + $0x8] sm:$0xff] %vm404_vm0, %v1580_v0 }
  0x26   : > { %407 = vst.msk [vmem:[#allocation3] sm:$0xff] %vm404_vm0, %v1580_v0  ;;  %408 = vst.msk [vmem:[#allocation3 + $0x8] sm:$0xff] %vm404_vm0, %v1580_v0 }
  0x27   : > { %409 = vst.msk [vmem:[#allocation3 + $0x10] sm:$0xff] %vm404_vm0, %v1580_v0  ;;  %410 = vst.msk [vmem:[#allocation3 + $0x18] sm:$0xff] %vm404_vm0, %v1580_v0 }
  0x28   : > { %411 = vst.msk [vmem:[#allocation3 + $0x20] sm:$0xff] %vm404_vm0, %v1580_v0  ;;  %412 = vst.msk [vmem:[#allocation3 + $0x28] sm:$0xff] %vm404_vm0, %v1580_v0 }
  0x29   : > { %416 = vst.msk [vmem:[#allocation5] sm:$0xff] %vm404_vm0, %v1580_v0  ;;  %417 = vst.msk [vmem:[#allocation5 + $0x8] sm:$0xff] %vm404_vm0, %v1580_v0 }
  0x2a   : > { %418 = vst.msk [vmem:[#allocation6] sm:$0xff] %vm404_vm0, %v1580_v0  ;;  %419 = vst.msk [vmem:[#allocation6 + $0x8] sm:$0xff] %vm404_vm0, %v1580_v0 }
  0x2b   : > { %420 = vst.msk [vmem:[#allocation6 + $0x10] sm:$0xff] %vm404_vm0, %v1580_v0  ;;  %421 = vst.msk [vmem:[#allocation6 + $0x18] sm:$0xff] %vm404_vm0, %v1580_v0 }
  0x2c   : > { %422 = vst.msk [vmem:[#allocation6 + $0x20] sm:$0xff] %vm404_vm0, %v1580_v0  ;;  %423 = vst.msk [vmem:[#allocation6 + $0x28] sm:$0xff] %vm404_vm0, %v1580_v0 }
  0x2d   : > { %424 = vst.msk [vmem:[#allocation6 + $0x30] sm:$0xff] %vm404_vm0, %v1580_v0  ;;  %425 = vst.msk [vmem:[#allocation6 + $0x38] sm:$0xff] %vm404_vm0, %v1580_v0 }
  0x2e   : > { %414 = vst.msk [vmem:[#allocation4] sm:$0xff] %vm413_vm1, %v1580_v0  ;;  %415 = vst.msk [vmem:[#allocation4 + $0x8] sm:$0xff] %vm413_vm1, %v1580_v0 }
  0x2f PF: > { %v1754_v1 = vld [vmem:[%s398_s11] sm:$0xff]  ;;  %v1756_v2 = vld [vmem:[%s398_s11 + $0x8] sm:$0xff]  ;;  %v1581_v4 = vmov 0.0   ;;  %vm1582_vm2 = vmmov 0   ;;  %v434_v10 = vld [vmem:[%s2045_s2 + $0x10] sm:$0xff]  ;;  %vm476_vm3 = vcmask 523264  }
  0x30   : > { %v464_v3 = vld [vmem:[#allocation2] sm:$0xff]  ;;  %1313 = vmatprep.subr.bf16.mxu0 %v1581_v4  ;;  %v465_v5 = vld [vmem:[#allocation2 + $0x8] sm:$0xff]  ;;  %1315 = vmatprep.mubr.msk.bf16.mxu0 %vm1582_vm2, %v1581_v4  ;;  %v1583_v13 = vmov 0   ;;  %v435_v14 = vld [vmem:[%s2045_s2 + $0x18] sm:$0xff]  ;;  %v1584_v20 = vmov 1.0|1.0  }
  0x31   : > { %v466_v6 = vsub.f32 %v1754_v1, %v464_v3  ;;  %v467_v7 = vsub.f32 %v1756_v2, %v465_v5  ;;  %1327 = vmatprep.subr.bf16.mxu1 %v1581_v4  ;;  %1329 = vmatprep.mubr.msk.bf16.mxu1 %vm1582_vm2, %v1581_v4  ;;  %v436_v11 = vld [vmem:[%s2045_s2 + $0x20] sm:$0xff]  ;;  %v437_v17 = vld [vmem:[%s2045_s2 + $0x28] sm:$0xff]  ;;  %vm529_vm7 = vcmask 130048   ;;  %v1449_v22 = vld [vmem:[%s2044_s1 + $0x10] sm:$0xff]   ;;  %vm658_vm11 = vcmask 519168   ;;  %s1287_s29 = sshll.u32 %s1566_s17, 1 }
  0x32   : > { %1440 = vset.pattern.permute.xlu0 %v1583_v13  ;;  %1441 = vset.pattern.permute.xlu1 %v1583_v13  ;;  %v1447_v16 = vld [vmem:[%s2044_s1] sm:$0xff]   ;;  %v1448_v21 = vld [vmem:[%s2044_s1 + $0x8] sm:$0xff]   ;;  %v600_v43 = vld [vmem:[#allocation3 + $0x20] sm:$0xff]  ;;  %vm681_vm13 = vcmask 7168   ;;  %s1288_s18 = sshll.u32 %s1562_s16, 2  ;;  %s1102_s22 = sshll.u32 %s1731_s14, 4  ;;  %s1952_s22 = int_to_ptr.vmem [resolvable:$true] %s1102_s22 }
  0x33   : > { %v468_v8 = vmul.f32 0.5, %v466_v6  ;;  %v469_v9 = vmul.f32 0.5, %v467_v7  ;;  %496 = vperm.xlu0 %1440, %v434_v10   ;;  %506 = vperm.xlu1 %1441, %v436_v11   ;;  %v598_v29 = vld [vmem:[#allocation3 + $0x10] sm:$0xff]  ;;  %v599_v35 = vld [vmem:[#allocation3 + $0x18] sm:$0xff]  ;;  %v601_v52 = vld [vmem:[#allocation3 + $0x28] sm:$0xff]  ;;  %s1943_s19 = sadd.s32 %s1288_s18, %s1287_s29  ;;  %s1069_s25 = scalar_lea.sflag [#allocation10], %s1718_s12 }
  0x34   : > { %v432_v13 = vld [vmem:[%s2045_s2] sm:$0xff]  ;;  %s1292_s23 = sshll.u32 %s1943_s19, 6  ;;  %s1456_s28 = scalar_lea.vmem %s1952_s22, 128 }
  0x35   : > { %v470_v12 = vadd.f32 %v468_v8, %v464_v3  ;;  %v471_v15 = vadd.f32 %v469_v9, %v465_v5  ;;  %s1949_s21 = scalar_lea.hbm %s2053_s10, %s1292_s23  ;;  %p1457_p1 = scmp.ne.s32.totalorder %s1952_s22, %s1456_s28 }
  0x36   : > { %s1585_s16 = smov [#allocation9]  }
  0x37   : > { %vm472_vm4 = vcmp.ge.f32.partialorder %v470_v12, 1.0  ;;  %vm473_vm5 = vcmp.ge.f32.partialorder %v471_v15, 1.0  ;;  %501 = vperm.xlu0 %1440, %v435_v14   ;;  %511 = vperm.xlu1 %1441, %v437_v17   ;;  %v440_v14 = vld [vmem:[%s2047_s4] sm:$0xff]  ;;  %v452_v17 = vld [vmem:[%s2049_s6 + $0x10] sm:$0xff]  ;;  %p1458_p2 = pnand %p1457_p1, %p1697_p3  ;;  %s1460_s17 = sshll.u32 %s1585_s16, 4  ;;  %s1461_s17 = int_to_ptr.vmem [resolvable:$false] %s1460_s17 }
  0x38   : > { %v474_v18 = vsel %vm472_vm4, 0.0, %v470_v12  ;;  %v475_v19 = vsel %vm473_vm5, 0.0, %v471_v15  ;;  %vm1238_vm6 = vmpackc.low %vm473_vm5, %vm472_vm4  ;;  %v433_v12 = vld [vmem:[%s2045_s2 + $0x8] sm:$0xff]  ;;  %v456_v15 = vld [vmem:[%s2049_s6 + $0x30] sm:$0xff]  ;;  %s1462_s30 = scalar_lea.vmem %s1461_s17, 256  ;;  %p1463_p5 = scmp.lt.s32.totalorder %s1952_s22, %s1461_s17 }
  0x39   : > { %477 = vst.msk [vmem:[#allocation2] sm:$0xff] %vm476_vm3, %v474_v18  ;;  %478 = vst.msk [vmem:[#allocation2 + $0x8] sm:$0xff] %vm476_vm3, %v475_v19  ;;  %1314 = vmatpush3.bf16.msk.msra.mxu0 %vm1238_vm6, %v1584_v20  ;;  %v450_v18 = vld [vmem:[%s2049_s6] sm:$0xff]  ;;  %p1459_p4 = pneg %p1458_p2  ;;  %p1464_p6 = scmp.lt.s32.totalorder %s1462_s30, %s1456_s28 }
  0x3a   : > { %1343 = vmatprep.subr.bf16.mxu0 %v1581_v4  ;;  %v460_v19 = vld [vmem:[%s2051_s8] sm:$0xff] }
  0x3b   : > { %p1465_p7 = por %p1464_p6, %p1463_p5 }
  0x3c   : > { %1316 = vmatmul.mubr.msk.bf16.vlgmr.msra.gmra.mxu0 %vm529_vm7, %v1447_v16  ;;  %v454_v16 = vld [vmem:[%s2049_s6 + $0x20] sm:$0xff] }
  0x3d   : > { %1319 = vmatprep.mubr.msk.bf16.mxu0 %vm1582_vm2, %v1581_v4  ;;  %p1466_p9 = pnand %p1465_p7, %p1459_p4 }
  0x44   : > { %1320 = vmatmul.mubr.msk.bf16.gmra.mxu0 %vm529_vm7, %v1448_v21  ;;  %v669_v21 = vld [vmem:[#allocation4] sm:$0xff] }
  0x45   : > { %1323 = vmatprep.mubr.msk.bf16.mxu0 %vm1582_vm2, %v1581_v4 }
  0x4c   : > { %1324 = vmatmul.mubr.msk.bf16.gmra.mxu0 %vm529_vm7, %v1449_v22 }
  0x4d   : > { %1351 = vmatprep.mubr.msk.bf16.mxu0 %vm1582_vm2, %v1581_v4 }
  0xae   : > { %v497_v26 = vpop.permute.xlu0 %496  ;;  %v507_v38 = vpop.permute.xlu1 %506 }
  0xb2   : > { %v502_v32 = vpop.permute.xlu0 %501  ;;  %v512_v50 = vpop.permute.xlu1 %511 }
  0xfc   : > { %v1800_v23 = vpop.f32.mrf.mxu0 }
  0xfe   : > { %v1317_v24 = vpop.f32.mrf.mxu0 }
 0x100   : > { %v1802_v25 = vpop.f32.mrf.mxu0 }
 0x102   : > { %v1318_v27 = vpop.f32.mrf.mxu0 }
 0x104   : > { %v581_v28 = vpop.f32.mrf.mxu0 }
 0x105   : > { %v582_v30 = vadd.f32 %v581_v28, %v497_v26  ;;  %v670_v26 = vld [vmem:[#allocation4 + $0x8] sm:$0xff] }
 0x106   : > { %v1321_v31 = vpop.f32.mrf.mxu0 }
 0x107   : > { %v604_v33 = vsub.f32 %v582_v30, %v598_v29 }
 0x108   : > { %v584_v34 = vpop.f32.mrf.mxu0 }
 0x109   : > { %v610_v36 = vmul.f32 0.5, %v604_v33  ;;  %v585_v37 = vadd.f32 %v584_v34, %v502_v32  ;;  %v596_v33 = vld [vmem:[#allocation3] sm:$0xff] }
 0x10a   : > { %v1322_v39 = vpop.f32.mrf.mxu0 }
 0x10b   : > { %v616_v40 = vadd.f32 %v610_v36, %v598_v29  ;;  %v605_v41 = vsub.f32 %v585_v37, %v599_v35 }
 0x10c   : > { %v589_v42 = vpop.f32.mrf.mxu0 }
 0x10d   : > { %v611_v44 = vmul.f32 0.5, %v605_v41  ;;  %v590_v45 = vadd.f32 %v589_v42, %v507_v38  ;;  %vm622_vm8 = vcmp.ge.f32.partialorder %v616_v40, 1.0 }
 0x10e   : > { %v1325_v46 = vpop.f32.mrf.mxu0  ;;  %v628_v47 = vsel %vm622_vm8, 0.0, %v616_v40  ;;  %v1245_v60 = vsel %vm622_vm8, 1.0, %v1581_v4 }
 0x10f   : > { %v617_v48 = vadd.f32 %v611_v44, %v599_v35  ;;  %v606_v49 = vsub.f32 %v590_v45, %v600_v43  ;;  %634 = vst.msk [vmem:[#allocation3 + $0x10] sm:$0xff] %vm476_vm3, %v628_v47  ;;  %v597_v35 = vld [vmem:[#allocation3 + $0x8] sm:$0xff] }
 0x110   : > { %v592_v51 = vpop.f32.mrf.mxu0 }
 0x111   : > { %v612_v53 = vmul.f32 0.5, %v606_v49  ;;  %v593_v54 = vadd.f32 %v592_v51, %v512_v50  ;;  %vm623_vm9 = vcmp.ge.f32.partialorder %v617_v48, 1.0  ;;  %v457_v51 = vld [vmem:[%s2049_s6 + $0x38] sm:$0xff] }
 0x112   : > { %v1326_v55 = vpop.f32.mrf.mxu0  ;;  %v629_v56 = vsel %vm623_vm9, 0.0, %v617_v48  ;;  %v1246_v6 = vsel %vm623_vm9, 1.0, %v1581_v4 }
 0x113   : > { %v618_v57 = vadd.f32 %v612_v53, %v600_v43  ;;  %v607_v58 = vsub.f32 %v593_v54, %v601_v52  ;;  %635 = vst.msk [vmem:[#allocation3 + $0x18] sm:$0xff] %vm476_vm3, %v629_v56  ;;  %v453_v53 = vld [vmem:[%s2049_s6 + $0x18] sm:$0xff]  ;;  %v451_v54 = vld [vmem:[%s2049_s6 + $0x8] sm:$0xff] }
 0x114   : > { %v461_v55 = vld [vmem:[%s2051_s8 + $0x8] sm:$0xff] }
 0x115   : > { %v613_v59 = vmul.f32 0.5, %v607_v58  ;;  %vm624_vm10 = vcmp.ge.f32.partialorder %v618_v57, 1.0 }
 0x116   : > { %v1247_v61 = vsel %vm624_vm10, 1.0, %v1581_v4  ;;  %v630_v62 = vsel %vm624_vm10, 0.0, %v618_v57 }
 0x117   : > { %v619_v63 = vadd.f32 %v613_v59, %v601_v52  ;;  %v661_v0 = vmul.f32 %v1247_v61, %v1245_v60  ;;  %636 = vst.msk [vmem:[#allocation3 + $0x20] sm:$0xff] %vm476_vm3, %v630_v62  ;;  %v1295_v3 = vpack.c.bf16 %v1247_v61, %v1247_v61  ;;  %v455_v52 = vld [vmem:[%s2049_s6 + $0x28] sm:$0xff] }
 0x119   : > { %v663_v5 = vsel %vm476_vm3, %v661_v0, 0.0  ;;  %659 = vst.msk [vmem:[%s1731_s14] sm:$0xf] %vm658_vm11, %v1295_v3  ;;  %vm625_vm12 = vcmp.ge.f32.partialorder %v619_v63, 1.0  ;;  %v1450_v0 = vld [vmem:[%s2046_s3] sm:$0xff]  }
 0x11a   : > { %664 = vadd.xlane.f32.xlu0 %v663_v5  ;;  %v1248_v7 = vsel %vm625_vm12, 1.0, %v1581_v4  ;;  %v631_v8 = vsel %vm625_vm12, 0.0, %v619_v63  ;;  %v1451_v3 = vld [vmem:[%s2048_s5] sm:$0xff]  }
 0x11b   : > { %v662_v9 = vmul.f32 %v1248_v7, %v1246_v6  ;;  %637 = vst.msk [vmem:[#allocation3 + $0x28] sm:$0xff] %vm476_vm3, %v631_v8  ;;  %v1296_v10 = vpack.c.bf16 %v1248_v7, %v1248_v7  ;;  %v766_v8 = vld [vmem:[#allocation5] sm:$0xff] }
 0x11d   : > { %v666_v11 = vsel %vm476_vm3, %v662_v9, 0.0  ;;  %660 = vst.msk [vmem:[%s1731_s14 + $0x4] sm:$0xf] %vm658_vm11, %v1296_v10 }
 0x11e   : > { %667 = vadd.xlane.f32.xlu1 %v666_v11 }
 0x12f   : > { %491 = vperm.xlu1 %1441, %v433_v12  }
 0x130   : > { %486 = vperm.xlu0 %1440, %v432_v13  }
 0x133   : > { %703 = vperm.xlu1 %1441, %v440_v14  }
 0x137   : > { %817 = vperm.xlu1 %1441, %v456_v15   ;;  %v767_v15 = vld [vmem:[#allocation5 + $0x8] sm:$0xff] }
 0x13b   : > { %807 = vperm.xlu1 %1441, %v454_v16  }
 0x13f   : > { %797 = vperm.xlu1 %1441, %v452_v17  }
 0x143   : > { %787 = vperm.xlu1 %1441, %v450_v18  }
 0x147   : > { %1000 = vperm.xlu1 %1441, %v460_v19  }
 0x1a3   : > { %v665_v22 = vpop.xlane.xlu0 %664 }
 0x1a4   : > { %v671_v24 = vsub.f32 %v665_v22, %v669_v21 }
 0x1a6   : > { %v673_v27 = vmul.f32 0.5, %v671_v24 }
 0x1a7   : > { %v668_v28 = vpop.xlane.xlu1 %667 }
 0x1a8   : > { %v675_v29 = vadd.f32 %v673_v27, %v669_v21  ;;  %v672_v30 = vsub.f32 %v668_v28, %v670_v26  ;;  %v1453_v27 = vld [vmem:[%s2048_s5 + $0x10] sm:$0xff]   ;;  %v1454_v28 = vld [vmem:[%s2048_s5 + $0x18] sm:$0xff]  }
 0x1aa   : > { %vm677_vm14 = vcmp.ge.f32.partialorder %v675_v29, 0.5  ;;  %v674_v31 = vmul.f32 0.5, %v672_v30 }
 0x1ab   : > { %v679_v32 = vsel %vm677_vm14, 0.0, %v675_v29  ;;  %v487_v34 = vpop.permute.xlu0 %486  ;;  %v492_v36 = vpop.permute.xlu1 %491  ;;  %v1251_v43 = vsel %vm677_vm14, 1.0, %v1581_v4 }
 0x1ac   : > { %682 = vst.msk [vmem:[#allocation4] sm:$0xff] %vm681_vm13, %v679_v32  ;;  %v676_v37 = vadd.f32 %v674_v31, %v670_v26  ;;  %v574_v38 = vadd.f32 %v1800_v23, %v487_v34  ;;  %v577_v39 = vadd.f32 %v1802_v25, %v492_v36  ;;  %v441_v23 = vld [vmem:[%s2047_s4 + $0x8] sm:$0xff]  ;;  %v924_v36 = vld [vmem:[#allocation6 + $0x10] sm:$0xff] }
 0x1ae   : > { %vm678_vm15 = vcmp.ge.f32.partialorder %v676_v37, 0.5  ;;  %v602_v40 = vsub.f32 %v574_v38, %v596_v33  ;;  %v603_v41 = vsub.f32 %v577_v39, %v597_v35 }
 0x1af   : > { %v680_v42 = vsel %vm678_vm15, 0.0, %v676_v37  ;;  %v1252_v44 = vsel %vm678_vm15, 1.0, %v1581_v4  ;;  %v704_v5 = vpop.permute.xlu1 %703 }
 0x1b0   : > { %683 = vst.msk [vmem:[#allocation4 + $0x8] sm:$0xff] %vm681_vm13, %v680_v42  ;;  %v608_v45 = vmul.f32 0.5, %v602_v40  ;;  %v609_v46 = vmul.f32 0.5, %v603_v41  ;;  %v1442_v47 = vpack.i.bf16 %v1252_v44, %v1251_v43  ;;  %v922_v40 = vld [vmem:[#allocation6] sm:$0xff]  ;;  %v925_v44 = vld [vmem:[#allocation6 + $0x18] sm:$0xff] }
 0x1b2   : > { %v614_v48 = vadd.f32 %v608_v45, %v596_v33  ;;  %v615_v49 = vadd.f32 %v609_v46, %v597_v35  ;;  %1443 = vperm.xlu0 %1440, %v1442_v47  }
 0x1b3   : > { %v818_v29 = vpop.permute.xlu1 %817 }
 0x1b4   : > { %vm620_vm0 = vcmp.ge.f32.partialorder %v614_v48, 1.0  ;;  %vm621_vm1 = vcmp.ge.f32.partialorder %v615_v49, 1.0 }
 0x1b5   : > { %v626_v25 = vsel %vm620_vm0, 0.0, %v614_v48  ;;  %v627_v50 = vsel %vm621_vm1, 0.0, %v615_v49  ;;  %v1243_v59 = vsel %vm620_vm0, 1.0, %v1581_v4  ;;  %v1244_v60 = vsel %vm621_vm1, 1.0, %v1581_v4 }
 0x1b6   : > { %708 = vperm.xlu0 %1440, %v441_v23   ;;  %632 = vst.msk [vmem:[#allocation3] sm:$0xff] %vm476_vm3, %v626_v25  ;;  %633 = vst.msk [vmem:[#allocation3 + $0x8] sm:$0xff] %vm476_vm3, %v627_v50  ;;  %v923_v23 = vld [vmem:[#allocation6 + $0x8] sm:$0xff] }
 0x1b7   : > { %v808_v31 = vpop.permute.xlu1 %807 }
 0x1ba   : > { %822 = vperm.xlu0 %1440, %v457_v51  }
 0x1bb   : > { %v798_v33 = vpop.permute.xlu1 %797 }
 0x1be   : > { %812 = vperm.xlu0 %1440, %v455_v52  }
 0x1bf   : > { %v788_v38 = vpop.permute.xlu1 %787 }
 0x1c2   : > { %802 = vperm.xlu0 %1440, %v453_v53  }
 0x1c6   : > { %792 = vperm.xlu0 %1440, %v451_v54   ;;  %v928_v54 = vld [vmem:[#allocation6 + $0x30] sm:$0xff] }
 0x1ca   : > { %1005 = vperm.xlu0 %1440, %v461_v55  }
 0x22d   : > { %v1444_v56 = vpop.permute.xlu0 %1443 }
 0x22e   : > { %v1446_v57 = vunpack.i.h.bf16 %v1444_v56  ;;  %v1445_v58 = vunpack.i.l.bf16 %v1444_v56 }
 0x230   : > { %v698_v61 = vmul.f32 %v1445_v58, %v1243_v59  ;;  %v699_v62 = vmul.f32 %v1446_v57, %v1244_v60  ;;  %v926_v60 = vld [vmem:[#allocation6 + $0x20] sm:$0xff] }
 0x231   : > { %v709_v11 = vpop.permute.xlu0 %708 }
 0x232   : > { %v700_v63 = vpack.c.bf16 %v699_v62, %v698_v61 }
 0x234   : > { %1328 = vmatpush3.bf16.msra.mxu1 %v700_v63 }
 0x235   : > { %v823_v30 = vpop.permute.xlu0 %822 }
 0x237   : > { %1330 = vmatmul.mubr.msk.bf16.vlgmr.msra.gmra.mxu1 %vm529_vm7, %v1450_v0 }
 0x238   : > { %1335 = vmatprep.mubr.msk.bf16.mxu1 %vm529_vm7, %v1451_v3 }
 0x239   : > { %v813_v32 = vpop.permute.xlu0 %812 }
 0x23d   : > { %v803_v34 = vpop.permute.xlu0 %802 }
 0x241   : > { %v793_v48 = vpop.permute.xlu0 %792 }
 0x2f7   : > { %v753_v6 = vpop.f32.mrf.mxu1 }
 0x2f8   : > { %v754_v7 = vadd.f32 %v753_v6, %v704_v5  ;;  %v929_v5 = vld [vmem:[#allocation6 + $0x38] sm:$0xff] }
 0x2f9   : > { %v1331_v9 = vpop.f32.mrf.mxu1 }
 0x2fa   : > { %v762_v10 = vadd.f32 %v754_v7, %v1754_v1 }
 0x2fb   : > { %v756_v12 = vpop.f32.mrf.mxu1 }
 0x2fc   : > { %764 = vst.msk [vmem:[%s1729_s15] sm:$0xff] %vm476_vm3, %v762_v10  ;;  %v768_v13 = vsub.f32 %v762_v10, %v766_v8  ;;  %v757_v14 = vadd.f32 %v756_v12, %v709_v11  ;;  %v927_v12 = vld [vmem:[#allocation6 + $0x28] sm:$0xff] }
 0x2fd   : > { %v1332_v16 = vpop.f32.mrf.mxu1 }
 0x2fe   : > { %v770_v17 = vmul.f32 0.5, %v768_v13  ;;  %v763_v18 = vadd.f32 %v757_v14, %v1756_v2  ;;  %v1452_v2 = vld [vmem:[%s2048_s5 + $0x8] sm:$0xff]  }
 0x300   : > { %765 = vst.msk [vmem:[%s1729_s15 + $0x8] sm:$0xff] %vm476_vm3, %v763_v18  ;;  %v769_v19 = vsub.f32 %v763_v18, %v767_v15  ;;  %v772_v21 = vadd.f32 %v770_v17, %v766_v8 }
 0x302   : > { %v771_v22 = vmul.f32 0.5, %v769_v19  ;;  %vm774_vm2 = vcmp.ge.f32.partialorder %v772_v21, 1.0 }
 0x303   : > { %v776_v24 = vsel %vm774_vm2, 0.0, %v772_v21 }
 0x304   : > { %v773_v26 = vadd.f32 %v771_v22, %v767_v15  ;;  %778 = vst.msk [vmem:[#allocation5] sm:$0xff] %vm476_vm3, %v776_v24 }
 0x306   : > { %vm775_vm4 = vcmp.ge.f32.partialorder %v773_v26, 1.0 }
 0x307   : > { %v777_v1 = vsel %vm775_vm4, 0.0, %v773_v26  ;;  %vm1261_vm5 = vmpackc.low %vm775_vm4, %vm774_vm2 }
 0x308   : > { %779 = vst.msk [vmem:[#allocation5 + $0x8] sm:$0xff] %vm476_vm3, %v777_v1  ;;  %1333 = vmatprep.subr.msk.bf16.mxu1 %vm1261_vm5, %v1584_v20 }
 0x309   : > { %1334 = vmatpush3.bf16.msk.msra.mxu1 %vm1261_vm5, %v1584_v20 }
 0x30c   : > { %1336 = vmatmul.mubr.msk.bf16.vlgmr.msra.gmra.mxu1 %vm529_vm7, %v1452_v2 }
 0x30d   : > { %1339 = vmatprep.mubr.msk.bf16.mxu1 %vm529_vm7, %v1453_v27 }
 0x314   : > { %1340 = vmatmul.mubr.msk.bf16.gmra.mxu1 %vm529_vm7, %v1454_v28 }
 0x3cc   : > { %v1337_v35 = vpop.f32.mrf.mxu1 }
 0x3cd   : > { %v900_v37 = vadd.f32 %v1337_v35, %v798_v33 }
 0x3ce   : > { %v891_v39 = vpop.f32.mrf.mxu1 }
 0x3cf   : > { %v932_v41 = vsub.f32 %v900_v37, %v924_v36  ;;  %v892_v42 = vadd.f32 %v891_v39, %v788_v38 }
 0x3d0   : > { %v1338_v43 = vpop.f32.mrf.mxu1 }
 0x3d1   : > { %v940_v45 = vmul.f32 0.5, %v932_v41  ;;  %v930_v46 = vsub.f32 %v892_v42, %v922_v40  ;;  %v903_v47 = vadd.f32 %v1338_v43, %v803_v34 }
 0x3d2   : > { %v894_v49 = vpop.f32.mrf.mxu1 }
 0x3d3   : > { %v1908_v25 = vadd.f32 %v940_v45, %v924_v36  ;;  %v938_v50 = vmul.f32 0.5, %v930_v46  ;;  %v933_v51 = vsub.f32 %v903_v47, %v925_v44  ;;  %v895_v52 = vadd.f32 %v894_v49, %v793_v48 }
 0x3d4   : > { %v1341_v53 = vpop.f32.mrf.mxu1 }
 0x3d5   : > { %v946_v55 = vadd.f32 %v938_v50, %v922_v40  ;;  %v941_v56 = vmul.f32 0.5, %v933_v51  ;;  %v931_v57 = vsub.f32 %v895_v52, %v923_v23  ;;  %v916_v58 = vadd.f32 %v1341_v53, %v818_v29 }
 0x3d6   : > { %v907_v59 = vpop.f32.mrf.mxu1  ;;  %vm956_vm6 = vcmp.ge.f32.partialorder %v1908_v25, 1.0 }
 0x3d7   : > { %v949_v61 = vadd.f32 %v941_v56, %v925_v44  ;;  %v939_v62 = vmul.f32 0.5, %v931_v57  ;;  %v936_v63 = vsub.f32 %v916_v58, %v928_v54  ;;  %v908_v0 = vadd.f32 %v907_v59, %v808_v31  ;;  %v1455_v31 = vld [vmem:[%s2050_s7] sm:$0xff]  }
 0x3d8   : > { %v1342_v3 = vpop.f32.mrf.mxu1  ;;  %v964_v6 = vsel %vm956_vm6, 0.0, %v1908_v25  ;;  %vm954_vm7 = vcmp.ge.f32.partialorder %v946_v55, 1.0 }
 0x3d9   : > { %v947_v7 = vadd.f32 %v939_v62, %v923_v23  ;;  %v944_v8 = vmul.f32 0.5, %v936_v63  ;;  %v934_v9 = vsub.f32 %v908_v0, %v926_v60  ;;  %v919_v10 = vadd.f32 %v1342_v3, %v823_v30  ;;  %972 = vst.msk [vmem:[#allocation6 + $0x10] sm:$0xff] %vm476_vm3, %v964_v6 }
 0x3da   : > { %v910_v11 = vpop.f32.mrf.mxu1  ;;  %vm957_vm8 = vcmp.ge.f32.partialorder %v949_v61, 1.0  ;;  %v962_v13 = vsel %vm954_vm7, 0.0, %v946_v55 }
 0x3db   : > { %v952_v14 = vadd.f32 %v944_v8, %v928_v54  ;;  %v942_v15 = vmul.f32 0.5, %v934_v9  ;;  %v937_v16 = vsub.f32 %v919_v10, %v929_v5  ;;  %v911_v17 = vadd.f32 %v910_v11, %v813_v32  ;;  %970 = vst.msk [vmem:[#allocation6] sm:$0xff] %vm476_vm3, %v962_v13  ;;  %vm1280_vm0 = vmpackc.low %vm957_vm8, %vm956_vm6 }
 0x3dc   : > { %v965_v18 = vsel %vm957_vm8, 0.0, %v949_v61  ;;  %vm955_vm9 = vcmp.ge.f32.partialorder %v947_v7, 1.0 }
 0x3dd   : > { %v950_v19 = vadd.f32 %v942_v15, %v926_v60  ;;  %v945_v21 = vmul.f32 0.5, %v937_v16  ;;  %v935_v22 = vsub.f32 %v911_v17, %v927_v12  ;;  %vm960_vm10 = vcmp.ge.f32.partialorder %v952_v14, 1.0  ;;  %973 = vst.msk [vmem:[#allocation6 + $0x18] sm:$0xff] %vm476_vm3, %v965_v18  ;;  %vm1282_vm1 = vmpackc.low %vm955_vm9, %vm954_vm7 }
 0x3de   : > { %v968_v24 = vsel %vm960_vm10, 0.0, %v952_v14  ;;  %v963_v26 = vsel %vm955_vm9, 0.0, %v947_v7 }
 0x3df   : > { %v953_v1 = vadd.f32 %v945_v21, %v929_v5  ;;  %v943_v2 = vmul.f32 0.5, %v935_v22  ;;  %976 = vst.msk [vmem:[#allocation6 + $0x30] sm:$0xff] %vm476_vm3, %v968_v24  ;;  %vm958_vm11 = vcmp.ge.f32.partialorder %v950_v19, 1.0  ;;  %971 = vst.msk [vmem:[#allocation6 + $0x8] sm:$0xff] %vm476_vm3, %v963_v26 }
 0x3e0   : > { %v966_v27 = vsel %vm958_vm11, 0.0, %v950_v19 }
 0x3e1   : > { %v951_v28 = vadd.f32 %v943_v2, %v927_v12  ;;  %vm961_vm12 = vcmp.ge.f32.partialorder %v953_v1, 1.0  ;;  %974 = vst.msk [vmem:[#allocation6 + $0x20] sm:$0xff] %vm476_vm3, %v966_v27 }
 0x3e2   : > { %v969_v29 = vsel %vm961_vm12, 0.0, %v953_v1  ;;  %vm1276_vm13 = vmpackc.low %vm961_vm12, %vm960_vm10 }
 0x3e3   : > { %977 = vst.msk [vmem:[#allocation6 + $0x38] sm:$0xff] %vm476_vm3, %v969_v29  ;;  %1344 = vmatpush3.bf16.msk.msra.mxu0 %vm1276_vm13, %v1584_v20  ;;  %vm959_vm14 = vcmp.ge.f32.partialorder %v951_v28, 1.0 }
 0x3e4   : > { %1345 = vmatprep.subr.bf16.mxu0 %v1581_v4  ;;  %v967_v30 = vsel %vm959_vm14, 0.0, %v951_v28  ;;  %vm1278_vm15 = vmpackc.low %vm959_vm14, %vm958_vm11 }
 0x3e5   : > { %975 = vst.msk [vmem:[#allocation6 + $0x28] sm:$0xff] %vm476_vm3, %v967_v30 }
 0x3e7   : > { %1346 = vmatpush3.bf16.msk.msra.mxu0 %vm1278_vm15, %v1584_v20 }
 0x3e8   : > { %1347 = vmatprep.subr.bf16.mxu0 %v1581_v4 }
 0x3eb   : > { %1348 = vmatpush3.bf16.msk.msra.mxu0 %vm1280_vm0, %v1584_v20 }
 0x3ec   : > { %1349 = vmatprep.subr.bf16.mxu0 %v1581_v4 }
 0x3ef   : > { %1350 = vmatpush3.bf16.msk.msra.mxu0 %vm1282_vm1, %v1584_v20 }
 0x3f2   : > { %1352 = vmatmul.mubr.msk.bf16.vlgmr.msra.gmra.mxu0 %vm476_vm3, %v1455_v31 }
 0x3f3   : > { %1469 = shalt.err (!%p1466_p9)
}
 0x3f4   : > { %s1470_s14 = scalar_lea.hbm %s1949_s21, 128  ;;  %s1474_s23 = scalar_lea.hbm %s2053_s10, 512 }
 0x3f5   : > { %p1471_p10 = scmp.ne.s32.totalorder %s1949_s21, %s1470_s14  ;;  %p1475_p13 = scmp.lt.s32.totalorder %s1949_s21, %s2053_s10 }
 0x3f6   : > { %p1476_p0 = scmp.lt.s32.totalorder %s1474_s23, %s1470_s14 }
 0x3f7   : > { %p1472_p11 = pnand %p1471_p10, %p1697_p3 }
 0x3f8   : > { %p1477_p1 = por %p1476_p0, %p1475_p13 }
 0x3f9   : > { %p1473_p12 = pneg %p1472_p11 }
 0x3fb   : > { %p1478_p2 = pnand %p1477_p1, %p1473_p12 }
 0x3fd   : > { %1481 = shalt.err (!%p1478_p2)
}
 0x3fe   : > { %s1586_s28 = smov 64   ;;  %s1587_s16 = smov 4   ;;  %v1001_v4 = vpop.permute.xlu1 %1000  ;;  %v1057_v33 = vld [vmem:[%s1729_s15] sm:$0xff]  ;;  %v1006_v36 = vpop.permute.xlu0 %1005  ;;  %v1058_v39 = vld [vmem:[%s1729_s15 + $0x8] sm:$0xff] }
 0x3ff   : > { %1356 = dma.vmem_to_hbm [thread:$0]  (%p1697_p3), %s1952_s22, 128, %s1949_s21, %s1069_s25, %s1586_s28, %s1586_s28, %s1587_s16  }
 0x400   : > { %s1289_s17 = sshll.u32 %s1943_s19, 7  ;;  %s1084_s30 = sshll.u32 %s1729_s15, 4  ;;  %s1988_s30 = int_to_ptr.vmem [resolvable:$true] %s1084_s30 }
 0x401   : > { %s1986_s22 = scalar_lea.hbm %s2052_s9, %s1289_s17  ;;  %s1064_s19 = scalar_lea.sflag [#allocation8], %s1718_s12 }
 0x402   : > { %s1482_s25 = scalar_lea.vmem %s1988_s30, 256  ;;  %s1588_s29 = smov [#allocation7]  }
 0x403   : > { %p1483_p4 = scmp.ne.s32.totalorder %s1988_s30, %s1482_s25  ;;  %s1486_s18 = sshll.u32 %s1588_s29, 4  ;;  %s1487_s18 = int_to_ptr.vmem [resolvable:$false] %s1486_s18 }
 0x404   : > { %s1488_s23 = scalar_lea.vmem %s1487_s18, 512  ;;  %p1489_p7 = scmp.lt.s32.totalorder %s1988_s30, %s1487_s18 }
 0x405   : > { %p1484_p5 = pnand %p1483_p4, %p1697_p3  ;;  %p1490_p9 = scmp.lt.s32.totalorder %s1488_s23, %s1482_s25 }
 0x407   : > { %p1485_p6 = pneg %p1484_p5  ;;  %p1491_p10 = por %p1490_p9, %p1489_p7 }
 0x409   : > { %p1492_p11 = pnand %p1491_p10, %p1485_p6 }
 0x4b2   : > { %v1050_v20 = vpop.f32.mrf.mxu0 }
 0x4b3   : > { %v1051_v32 = vadd.f32 %v1050_v20, %v1001_v4 }
 0x4b4   : > { %v1353_v34 = vpop.f32.mrf.mxu0 }
 0x4b5   : > { %v1059_v35 = vadd.f32 %v1057_v33, %v1051_v32 }
 0x4b6   : > { %v1053_v37 = vpop.f32.mrf.mxu0 }
 0x4b7   : > { %1061 = vst.msk [vmem:[%s1729_s15] sm:$0xff] %vm476_vm3, %v1059_v35  ;;  %v1054_v38 = vadd.f32 %v1053_v37, %v1006_v36 }
 0x4b8   : > { %v1354_v40 = vpop.f32.mrf.mxu0 }
 0x4b9   : > { %v1060_v41 = vadd.f32 %v1058_v39, %v1054_v38 }
 0x4bb   : > { %1062 = vst.msk [vmem:[%s1729_s15 + $0x8] sm:$0xff] %vm476_vm3, %v1060_v41 }
 0x4bc   : > { %1495 = shalt.err (!%p1492_p11)
}
 0x4bd   : > { %s1496_s15 = scalar_lea.hbm %s1986_s22, 256  ;;  %s1500_s28 = scalar_lea.hbm %s2052_s9, 1024 }
 0x4be   : > { %p1497_p12 = scmp.ne.s32.totalorder %s1986_s22, %s1496_s15  ;;  %p1501_p1 = scmp.lt.s32.totalorder %s1986_s22, %s2052_s9 }
 0x4bf   : > { %p1502_p2 = scmp.lt.s32.totalorder %s1500_s28, %s1496_s15 }
 0x4c0   : > { %p1498_p13 = pnand %p1497_p12, %p1697_p3 }
 0x4c1   : > { %p1503_p4 = por %p1502_p2, %p1501_p1 }
 0x4c2   : > { %p1499_p0 = pneg %p1498_p13 }
 0x4c4   : > { %p1504_p5 = pnand %p1503_p4, %p1499_p0 }
 0x4c6   : > { %1507 = shalt.err (!%p1504_p5)
}
 0x4c7   : > { %s1589_s14 = smov 128   ;;  %s1590_s21 = smov 8  }
 0x4c8   : > { %1355 = dma.vmem_to_hbm [thread:$0]  (%p1697_p3), %s1988_s30, 256, %s1986_s22, %s1064_s19, %s1589_s14, %s1589_s14, %s1590_s21  }
 0x4c9 PF: > { %p1366_p6 = scmp.ge.s32.totalorder %s1578_s20, 2  ;;  %s1117_s25 = sand.u32 1, %s1550_s13  }
 0x4ca   : > { %s1118_s29 = scalar_lea.sflag [#allocation8], %s1117_s25 }
 0x4cb   : > { %p1360_p7 = pnand %p1366_p6, %p1706_p8 }
 0x4cd   : > { %p1361_p9 = pneg %p1360_p7 }
 0x4cf   : > { %1541 = dma.done.wait (%p1361_p9), %s1118_s29, 256  }
 0x4d0   : > { %1543 = vsyncadd (%p1361_p9), %s1118_s29, 4294967040  ;;  %s1127_s18 = scalar_lea.sflag [#allocation10], %s1117_s25 }
 0x4d1   : > { %1545 = dma.done.wait (%p1361_p9), %s1127_s18, 128  }
 0x4d2   : > { %1547 = vsyncadd (%p1361_p9), %s1127_s18, 4294967168  ;;  %s27_s20 = sadd.s32 1, %s1578_s20   ;;  %s2069_s13 = sld [smem:[#allocation13_spill]] }
 0x4d3   : > { %p24_p10 = scmp.ge.s32.totalorder %s27_s20, 6   ;;  %s2070_s14 = sld [smem:[#allocation14_spill]] }
 0x4d4   : > { %s2071_s15 = sld [smem:[#allocation19_spill]] }
 0x4d5   : > { %s2072_s16 = sld [smem:[#allocation15_spill]]  ;;  %26 = sbr.rel (!%p24_p10) target bundleno = 7 (0x7), region = 112 }
 0x4d6   : > { %s2073_s17 = sld [smem:[#allocation16_spill]] }
 0x4d7   : > { %s2074_s18 = sld [smem:[#allocation17_spill]] }
 0x4d8   : > { %s2075_s19 = sld [smem:[#allocation18_spill]] }
 0x4da   :  { %1132 = vsyncpa [#allocation8], 1 }
 0x4db   :  { %1134 = vsyncpa [#allocation8 + $0x1], 1 }
 0x4dc   :  { %1135 = vsyncpa [#allocation10], 1 }
 0x4dd   :  { %1137 = vsyncpa [#allocation10 + $0x1], 1 }

// kernel: tpu_custom_call.1
= control target key start
LH: loop header
LB: loop body
LE: loop exit
PB: predicated region body
PF: predicated region fallthrough
CT: control target
= control target key end

     0   :  { %16 = vsyncpa [#allocation8], 0  ;;  %s2043_s0 = inlined_call_operand.vmem [shape: f32[2,2,16,64], index: 0, kind: input, shape index: {}]   ;;  %s2044_s1 = inlined_call_operand.vmem [shape: bf16[48,16], index: 1, kind: input, shape index: {}]   ;;  %s2045_s2 = inlined_call_operand.vmem [shape: f32[48,1], index: 2, kind: input, shape index: {}]   ;;  %s2046_s3 = inlined_call_operand.vmem [shape: bf16[16,16], index: 3, kind: input, shape index: {}]   ;;  %s2047_s4 = inlined_call_operand.vmem [shape: f32[16,1], index: 4, kind: input, shape index: {}]   ;;  %s2048_s5 = inlined_call_operand.vmem [shape: bf16[64,16], index: 5, kind: input, shape index: {}]   ;;  %s2049_s6 = inlined_call_operand.vmem [shape: f32[64,1], index: 6, kind: input, shape index: {}]   ;;  %s2050_s7 = inlined_call_operand.vmem [shape: bf16[16,64], index: 7, kind: input, shape index: {}]   ;;  %s2051_s8 = inlined_call_operand.vmem [shape: f32[16,1], index: 8, kind: input, shape index: {}]   ;;  %s2052_s9 = inlined_call_operand.hbm [shape: f32[2,2,16,64], index: 9, kind: output, shape index: {0}]   ;;  %s2053_s10 = inlined_call_operand.hbm [shape: bf16[2,2,16,64], index: 10, kind: output, shape index: {1}]  }
   0x1   :  { %18 = vsyncpa [#allocation8 + $0x1], 0 }
   0x2   :  { %19 = vsyncpa [#allocation10], 0 }
   0x3   :  { %21 = vsyncpa [#allocation10 + $0x1], 0  ;;  %s1646_s13 = smov 0   ;;  %s1648_s14 = smov 0  }
   0x4   :  { %s1650_s15 = smov 0   ;;  %s1652_s16 = smov 0  }
   0x5   :  { %s1654_s17 = smov 0   ;;  %s1656_s18 = smov 0  }
   0x6   :  { %s1658_s19 = smov 0   ;;  %s1660_s20 = smov 0  }
   0x7 LB: > { %2060 = sst [smem:[#allocation13_spill]] %s1554_s14  ;;  %s1222_s21 = sadd.s32 4294967295, %s1578_s20   ;;  %s1578_s20 = sphi %s1660_s20, %s27_s20   ;;  %s1574_s19 = sphi %s1658_s19, %s2075_s19   ;;  %s1570_s18 = sphi %s1656_s18, %s2074_s18   ;;  %s1566_s17 = sphi %s1654_s17, %s2073_s17   ;;  %s1562_s16 = sphi %s1652_s16, %s2072_s16   ;;  %s1558_s15 = sphi %s1650_s15, %s2071_s15   ;;  %s1554_s14 = sphi %s1648_s14, %s2070_s14   ;;  %s1550_s13 = sphi %s1646_s13, %s2069_s13  }
   0x8   : > { %2061 = sst [smem:[#allocation14_spill]] %s1558_s15  ;;  %s1223_s22 = sadd.s32 4294967294, %s1578_s20  }
   0x9   : > { %2062 = sst [smem:[#allocation15_spill]] %s1570_s18  ;;  %s36_s23 = sadd.s32 1, %s1570_s18 }
   0xa   : > { %2063 = sst [smem:[#allocation16_spill]] %s1574_s19  ;;  %p37_p0 = scmp.ge.s32.totalorder %s36_s23, 2 }
   0xb   : > { %s39_s24 = sadd.s32 1, %s1574_s19  ;;  %p254_p1 = scmp.ne.s32.totalorder %s1558_s15, %s1554_s14 }
   0xc   : > { %p255_p2 = scmp.eq.s32.totalorder %s1222_s21, 3  ;;  %s2077_s23 = smov (%p37_p0, %s36_s23), 0 }
   0xd   : > { %2064 = sst [smem:[#allocation17_spill]] %s2077_s23  ;;  %s2079_s24 = smov (!%p37_p0, %s39_s24), %s1574_s19 }
   0xe   : > { %s239_s25 = ssub.s32 %s1570_s18, %s2077_s23  ;;  %p1697_p3 = por %p255_p2, %p254_p1 }
   0xf   : > { %p41_p4 = scmp.ge.s32.totalorder %s2079_s24, 2  ;;  %p260_p5 = scmp.ne.s32.totalorder %s1554_s14, %s1550_s13 }
  0x10   : > { %p261_p6 = scmp.eq.s32.totalorder %s1223_s22, 3  ;;  %p1226_p7 = scmp.ge.s32.totalorder %s1578_s20, 1 }
  0x11   : > { %s2081_s24 = smov (%p41_p4, %s2079_s24), 0  ;;  %p343_p9 = scmp.lt.s32.totalorder %s1578_s20, 5 }
  0x12   : > { %2066 = sst [smem:[#allocation18_spill]] %s2081_s24  ;;  %p1706_p8 = por %p261_p6, %p260_p5 }
  0x13   : > { %s240_s28 = ssub.s32 %s1574_s19, %s2081_s24  ;;  %s244_s29 = sadd.s32 1, %s1558_s15 }
  0x14   : > { %s241_s30 = sor.u32 %s240_s28, %s239_s25  ;;  %p344_p10 = pnand %p1226_p7, %p343_p9 }
  0x15   : > { %p242_p11 = scmp.eq.s32.totalorder %s241_s30, 0  ;;  %s1718_s12 = sand.u32 (!%p344_p10), 1, %s1554_s14  }
  0x16   : > { %347 = sbr.rel (%p344_p10) target bundleno = 1225 (0x4c9), region = 56  ;;  %p390_p12 = scmp.lt.s32.totalorder (!%p344_p10), %s1562_s16, 1 }
  0x17   : > { %s1715_s11 = scalar_select %p242_p11, %s1558_s15, %s244_s29  }
  0x18   : > { %s1227_s21 = sshll.u32 (!%p344_p10), %s1718_s12, 4  ;;  %s1228_s22 = sshll.u32 (!%p344_p10), %s1718_s12, 3 }
  0x19   : > { %2068 = sst [smem:[#allocation19_spill]] %s1715_s11  ;;  %p392_p13 = scmp.lt.s32.totalorder (!%p344_p10), %s1566_s17, 1 }
  0x1a   : > { %s1729_s15 = scalar_lea.vmem (!%p344_p10), [#allocation7], %s1227_s21  ;;  %s1731_s14 = scalar_lea.vmem (!%p344_p10), [#allocation9], %s1228_s22 }
  0x1b   : > { %s391_s24 = scalar_select %p390_p12, %s1562_s16, 1 }
  0x1c   : > { %s393_s28 = scalar_select %p392_p13, %s1566_s17, 1 }
  0x1d   : > { %s1230_s25 = sshll.u32 %s391_s24, 2  ;;  %p1232_p0 = scmp.ne.s32.totalorder %s1562_s16, 0 }
  0x1e   : > { %s1229_s30 = sshll.u32 %s393_s28, 1 }
  0x1f   : > { %s396_s29 = sadd.s32 %s1230_s25, %s1229_s30  ;;  %403 = sbr.rel (%p1232_p0) target bundleno = 47 (0x2f), region = 60 }
  0x20   : > { %s1231_s23 = sshll.u32 %s396_s29, 3 }
  0x21   : > { %s398_s11 = scalar_lea.vmem %s2043_s0, %s1231_s23 }
  0x24   : > { %vm404_vm0 = vcmask 523264   ;;  %vm413_vm1 = vcmask 7168   ;;  %v1580_v0 = vmov 0.0  }
  0x25   : > { %405 = vst.msk [vmem:[#allocation2] sm:$0xff] %vm404_vm0, %v1580_v0  ;;  %406 = vst.msk [vmem:[#allocation2 + $0x8] sm:$0xff] %vm404_vm0, %v1580_v0 }
  0x26   : > { %407 = vst.msk [vmem:[#allocation3] sm:$0xff] %vm404_vm0, %v1580_v0  ;;  %408 = vst.msk [vmem:[#allocation3 + $0x8] sm:$0xff] %vm404_vm0, %v1580_v0 }
  0x27   : > { %409 = vst.msk [vmem:[#allocation3 + $0x10] sm:$0xff] %vm404_vm0, %v1580_v0  ;;  %410 = vst.msk [vmem:[#allocation3 + $0x18] sm:$0xff] %vm404_vm0, %v1580_v0 }
  0x28   : > { %411 = vst.msk [vmem:[#allocation3 + $0x20] sm:$0xff] %vm404_vm0, %v1580_v0  ;;  %412 = vst.msk [vmem:[#allocation3 + $0x28] sm:$0xff] %vm404_vm0, %v1580_v0 }
  0x29   : > { %416 = vst.msk [vmem:[#allocation5] sm:$0xff] %vm404_vm0, %v1580_v0  ;;  %417 = vst.msk [vmem:[#allocation5 + $0x8] sm:$0xff] %vm404_vm0, %v1580_v0 }
  0x2a   : > { %418 = vst.msk [vmem:[#allocation6] sm:$0xff] %vm404_vm0, %v1580_v0  ;;  %419 = vst.msk [vmem:[#allocation6 + $0x8] sm:$0xff] %vm404_vm0, %v1580_v0 }
  0x2b   : > { %420 = vst.msk [vmem:[#allocation6 + $0x10] sm:$0xff] %vm404_vm0, %v1580_v0  ;;  %421 = vst.msk [vmem:[#allocation6 + $0x18] sm:$0xff] %vm404_vm0, %v1580_v0 }
  0x2c   : > { %422 = vst.msk [vmem:[#allocation6 + $0x20] sm:$0xff] %vm404_vm0, %v1580_v0  ;;  %423 = vst.msk [vmem:[#allocation6 + $0x28] sm:$0xff] %vm404_vm0, %v1580_v0 }
  0x2d   : > { %424 = vst.msk [vmem:[#allocation6 + $0x30] sm:$0xff] %vm404_vm0, %v1580_v0  ;;  %425 = vst.msk [vmem:[#allocation6 + $0x38] sm:$0xff] %vm404_vm0, %v1580_v0 }
  0x2e   : > { %414 = vst.msk [vmem:[#allocation4] sm:$0xff] %vm413_vm1, %v1580_v0  ;;  %415 = vst.msk [vmem:[#allocation4 + $0x8] sm:$0xff] %vm413_vm1, %v1580_v0 }
  0x2f PF: > { %v1754_v1 = vld [vmem:[%s398_s11] sm:$0xff]  ;;  %v1756_v2 = vld [vmem:[%s398_s11 + $0x8] sm:$0xff]  ;;  %v1581_v4 = vmov 0.0   ;;  %vm1582_vm2 = vmmov 0   ;;  %v434_v10 = vld [vmem:[%s2045_s2 + $0x10] sm:$0xff]  ;;  %vm476_vm3 = vcmask 523264  }
  0x30   : > { %v464_v3 = vld [vmem:[#allocation2] sm:$0xff]  ;;  %1313 = vmatprep.subr.bf16.mxu0 %v1581_v4  ;;  %v465_v5 = vld [vmem:[#allocation2 + $0x8] sm:$0xff]  ;;  %1315 = vmatprep.mubr.msk.bf16.mxu0 %vm1582_vm2, %v1581_v4  ;;  %v1583_v13 = vmov 0   ;;  %v435_v14 = vld [vmem:[%s2045_s2 + $0x18] sm:$0xff]  ;;  %v1584_v20 = vmov 1.0|1.0  }
  0x31   : > { %v466_v6 = vsub.f32 %v1754_v1, %v464_v3  ;;  %v467_v7 = vsub.f32 %v1756_v2, %v465_v5  ;;  %1327 = vmatprep.subr.bf16.mxu1 %v1581_v4  ;;  %1329 = vmatprep.mubr.msk.bf16.mxu1 %vm1582_vm2, %v1581_v4  ;;  %v436_v11 = vld [vmem:[%s2045_s2 + $0x20] sm:$0xff]  ;;  %v437_v17 = vld [vmem:[%s2045_s2 + $0x28] sm:$0xff]  ;;  %vm529_vm7 = vcmask 130048   ;;  %v1449_v22 = vld [vmem:[%s2044_s1 + $0x10] sm:$0xff]   ;;  %vm658_vm11 = vcmask 519168   ;;  %s1287_s29 = sshll.u32 %s1566_s17, 1 }
  0x32   : > { %1440 = vset.pattern.permute.xlu0 %v1583_v13  ;;  %1441 = vset.pattern.permute.xlu1 %v1583_v13  ;;  %v1447_v16 = vld [vmem:[%s2044_s1] sm:$0xff]   ;;  %v1448_v21 = vld [vmem:[%s2044_s1 + $0x8] sm:$0xff]   ;;  %v600_v43 = vld [vmem:[#allocation3 + $0x20] sm:$0xff]  ;;  %vm681_vm13 = vcmask 7168   ;;  %s1288_s18 = sshll.u32 %s1562_s16, 2  ;;  %s1102_s22 = sshll.u32 %s1731_s14, 4  ;;  %s1952_s22 = int_to_ptr.vmem [resolvable:$true] %s1102_s22 }
  0x33   : > { %v468_v8 = vmul.f32 0.5, %v466_v6  ;;  %v469_v9 = vmul.f32 0.5, %v467_v7  ;;  %496 = vperm.xlu0 %1440, %v434_v10   ;;  %506 = vperm.xlu1 %1441, %v436_v11   ;;  %v598_v29 = vld [vmem:[#allocation3 + $0x10] sm:$0xff]  ;;  %v599_v35 = vld [vmem:[#allocation3 + $0x18] sm:$0xff]  ;;  %v601_v52 = vld [vmem:[#allocation3 + $0x28] sm:$0xff]  ;;  %s1943_s19 = sadd.s32 %s1288_s18, %s1287_s29  ;;  %s1069_s25 = scalar_lea.sflag [#allocation10], %s1718_s12 }
  0x34   : > { %v432_v13 = vld [vmem:[%s2045_s2] sm:$0xff]  ;;  %s1292_s23 = sshll.u32 %s1943_s19, 6  ;;  %s1456_s28 = scalar_lea.vmem %s1952_s22, 128 }
  0x35   : > { %v470_v12 = vadd.f32 %v468_v8, %v464_v3  ;;  %v471_v15 = vadd.f32 %v469_v9, %v465_v5  ;;  %s1949_s21 = scalar_lea.hbm %s2053_s10, %s1292_s23  ;;  %p1457_p1 = scmp.ne.s32.totalorder %s1952_s22, %s1456_s28 }
  0x36   : > { %s1585_s16 = smov [#allocation9]  }
  0x37   : > { %vm472_vm4 = vcmp.ge.f32.partialorder %v470_v12, 1.0  ;;  %vm473_vm5 = vcmp.ge.f32.partialorder %v471_v15, 1.0  ;;  %501 = vperm.xlu0 %1440, %v435_v14   ;;  %511 = vperm.xlu1 %1441, %v437_v17   ;;  %v440_v14 = vld [vmem:[%s2047_s4] sm:$0xff]  ;;  %v452_v17 = vld [vmem:[%s2049_s6 + $0x10] sm:$0xff]  ;;  %p1458_p2 = pnand %p1457_p1, %p1697_p3  ;;  %s1460_s17 = sshll.u32 %s1585_s16, 4  ;;  %s1461_s17 = int_to_ptr.vmem [resolvable:$false] %s1460_s17 }
  0x38   : > { %v474_v18 = vsel %vm472_vm4, 0.0, %v470_v12  ;;  %v475_v19 = vsel %vm473_vm5, 0.0, %v471_v15  ;;  %vm1238_vm6 = vmpackc.low %vm473_vm5, %vm472_vm4  ;;  %v433_v12 = vld [vmem:[%s2045_s2 + $0x8] sm:$0xff]  ;;  %v456_v15 = vld [vmem:[%s2049_s6 + $0x30] sm:$0xff]  ;;  %s1462_s30 = scalar_lea.vmem %s1461_s17, 256  ;;  %p1463_p5 = scmp.lt.s32.totalorder %s1952_s22, %s1461_s17 }
  0x39   : > { %477 = vst.msk [vmem:[#allocation2] sm:$0xff] %vm476_vm3, %v474_v18  ;;  %478 = vst.msk [vmem:[#allocation2 + $0x8] sm:$0xff] %vm476_vm3, %v475_v19  ;;  %1314 = vmatpush3.bf16.msk.msra.mxu0 %vm1238_vm6, %v1584_v20  ;;  %v450_v18 = vld [vmem:[%s2049_s6] sm:$0xff]  ;;  %p1459_p4 = pneg %p1458_p2  ;;  %p1464_p6 = scmp.lt.s32.totalorder %s1462_s30, %s1456_s28 }
  0x3a   : > { %1343 = vmatprep.subr.bf16.mxu0 %v1581_v4  ;;  %v460_v19 = vld [vmem:[%s2051_s8] sm:$0xff] }
  0x3b   : > { %p1465_p7 = por %p1464_p6, %p1463_p5 }
  0x3c   : > { %1316 = vmatmul.mubr.msk.bf16.vlgmr.msra.gmra.mxu0 %vm529_vm7, %v1447_v16  ;;  %v454_v16 = vld [vmem:[%s2049_s6 + $0x20] sm:$0xff] }
  0x3d   : > { %1319 = vmatprep.mubr.msk.bf16.mxu0 %vm1582_vm2, %v1581_v4  ;;  %p1466_p9 = pnand %p1465_p7, %p1459_p4 }
  0x44   : > { %1320 = vmatmul.mubr.msk.bf16.gmra.mxu0 %vm529_vm7, %v1448_v21  ;;  %v669_v21 = vld [vmem:[#allocation4] sm:$0xff] }
  0x45   : > { %1323 = vmatprep.mubr.msk.bf16.mxu0 %vm1582_vm2, %v1581_v4 }
  0x4c   : > { %1324 = vmatmul.mubr.msk.bf16.gmra.mxu0 %vm529_vm7, %v1449_v22 }
  0x4d   : > { %1351 = vmatprep.mubr.msk.bf16.mxu0 %vm1582_vm2, %v1581_v4 }
  0xae   : > { %v497_v26 = vpop.permute.xlu0 %496  ;;  %v507_v38 = vpop.permute.xlu1 %506 }
  0xb2   : > { %v502_v32 = vpop.permute.xlu0 %501  ;;  %v512_v50 = vpop.permute.xlu1 %511 }
  0xfc   : > { %v1800_v23 = vpop.f32.mrf.mxu0 }
  0xfe   : > { %v1317_v24 = vpop.f32.mrf.mxu0 }
 0x100   : > { %v1802_v25 = vpop.f32.mrf.mxu0 }
 0x102   : > { %v1318_v27 = vpop.f32.mrf.mxu0 }
 0x104   : > { %v581_v28 = vpop.f32.mrf.mxu0 }
 0x105   : > { %v582_v30 = vadd.f32 %v581_v28, %v497_v26  ;;  %v670_v26 = vld [vmem:[#allocation4 + $0x8] sm:$0xff] }
 0x106   : > { %v1321_v31 = vpop.f32.mrf.mxu0 }
 0x107   : > { %v604_v33 = vsub.f32 %v582_v30, %v598_v29 }
 0x108   : > { %v584_v34 = vpop.f32.mrf.mxu0 }
 0x109   : > { %v610_v36 = vmul.f32 0.5, %v604_v33  ;;  %v585_v37 = vadd.f32 %v584_v34, %v502_v32  ;;  %v596_v33 = vld [vmem:[#allocation3] sm:$0xff] }
 0x10a   : > { %v1322_v39 = vpop.f32.mrf.mxu0 }
 0x10b   : > { %v616_v40 = vadd.f32 %v610_v36, %v598_v29  ;;  %v605_v41 = vsub.f32 %v585_v37, %v599_v35 }
 0x10c   : > { %v589_v42 = vpop.f32.mrf.mxu0 }
 0x10d   : > { %v611_v44 = vmul.f32 0.5, %v605_v41  ;;  %v590_v45 = vadd.f32 %v589_v42, %v507_v38  ;;  %vm622_vm8 = vcmp.ge.f32.partialorder %v616_v40, 1.0 }
 0x10e   : > { %v1325_v46 = vpop.f32.mrf.mxu0  ;;  %v628_v47 = vsel %vm622_vm8, 0.0, %v616_v40  ;;  %v1245_v60 = vsel %vm622_vm8, 1.0, %v1581_v4 }
 0x10f   : > { %v617_v48 = vadd.f32 %v611_v44, %v599_v35  ;;  %v606_v49 = vsub.f32 %v590_v45, %v600_v43  ;;  %634 = vst.msk [vmem:[#allocation3 + $0x10] sm:$0xff] %vm476_vm3, %v628_v47  ;;  %v597_v35 = vld [vmem:[#allocation3 + $0x8] sm:$0xff] }
 0x110   : > { %v592_v51 = vpop.f32.mrf.mxu0 }
 0x111   : > { %v612_v53 = vmul.f32 0.5, %v606_v49  ;;  %v593_v54 = vadd.f32 %v592_v51, %v512_v50  ;;  %vm623_vm9 = vcmp.ge.f32.partialorder %v617_v48, 1.0  ;;  %v457_v51 = vld [vmem:[%s2049_s6 + $0x38] sm:$0xff] }
 0x112   : > { %v1326_v55 = vpop.f32.mrf.mxu0  ;;  %v629_v56 = vsel %vm623_vm9, 0.0, %v617_v48  ;;  %v1246_v6 = vsel %vm623_vm9, 1.0, %v1581_v4 }
 0x113   : > { %v618_v57 = vadd.f32 %v612_v53, %v600_v43  ;;  %v607_v58 = vsub.f32 %v593_v54, %v601_v52  ;;  %635 = vst.msk [vmem:[#allocation3 + $0x18] sm:$0xff] %vm476_vm3, %v629_v56  ;;  %v453_v53 = vld [vmem:[%s2049_s6 + $0x18] sm:$0xff]  ;;  %v451_v54 = vld [vmem:[%s2049_s6 + $0x8] sm:$0xff] }
 0x114   : > { %v461_v55 = vld [vmem:[%s2051_s8 + $0x8] sm:$0xff] }
 0x115   : > { %v613_v59 = vmul.f32 0.5, %v607_v58  ;;  %vm624_vm10 = vcmp.ge.f32.partialorder %v618_v57, 1.0 }
 0x116   : > { %v1247_v61 = vsel %vm624_vm10, 1.0, %v1581_v4  ;;  %v630_v62 = vsel %vm624_vm10, 0.0, %v618_v57 }
 0x117   : > { %v619_v63 = vadd.f32 %v613_v59, %v601_v52  ;;  %v661_v0 = vmul.f32 %v1247_v61, %v1245_v60  ;;  %636 = vst.msk [vmem:[#allocation3 + $0x20] sm:$0xff] %vm476_vm3, %v630_v62  ;;  %v1295_v3 = vpack.c.bf16 %v1247_v61, %v1247_v61  ;;  %v455_v52 = vld [vmem:[%s2049_s6 + $0x28] sm:$0xff] }
 0x119   : > { %v663_v5 = vsel %vm476_vm3, %v661_v0, 0.0  ;;  %659 = vst.msk [vmem:[%s1731_s14] sm:$0xf] %vm658_vm11, %v1295_v3  ;;  %vm625_vm12 = vcmp.ge.f32.partialorder %v619_v63, 1.0  ;;  %v1450_v0 = vld [vmem:[%s2046_s3] sm:$0xff]  }
 0x11a   : > { %664 = vadd.xlane.f32.xlu0 %v663_v5  ;;  %v1248_v7 = vsel %vm625_vm12, 1.0, %v1581_v4  ;;  %v631_v8 = vsel %vm625_vm12, 0.0, %v619_v63  ;;  %v1451_v3 = vld [vmem:[%s2048_s5] sm:$0xff]  }
 0x11b   : > { %v662_v9 = vmul.f32 %v1248_v7, %v1246_v6  ;;  %637 = vst.msk [vmem:[#allocation3 + $0x28] sm:$0xff] %vm476_vm3, %v631_v8  ;;  %v1296_v10 = vpack.c.bf16 %v1248_v7, %v1248_v7  ;;  %v766_v8 = vld [vmem:[#allocation5] sm:$0xff] }
 0x11d   : > { %v666_v11 = vsel %vm476_vm3, %v662_v9, 0.0  ;;  %660 = vst.msk [vmem:[%s1731_s14 + $0x4] sm:$0xf] %vm658_vm11, %v1296_v10 }
 0x11e   : > { %667 = vadd.xlane.f32.xlu1 %v666_v11 }
 0x12f   : > { %491 = vperm.xlu1 %1441, %v433_v12  }
 0x130   : > { %486 = vperm.xlu0 %1440, %v432_v13  }
 0x133   : > { %703 = vperm.xlu1 %1441, %v440_v14  }
 0x137   : > { %817 = vperm.xlu1 %1441, %v456_v15   ;;  %v767_v15 = vld [vmem:[#allocation5 + $0x8] sm:$0xff] }
 0x13b   : > { %807 = vperm.xlu1 %1441, %v454_v16  }
 0x13f   : > { %797 = vperm.xlu1 %1441, %v452_v17  }
 0x143   : > { %787 = vperm.xlu1 %1441, %v450_v18  }
 0x147   : > { %1000 = vperm.xlu1 %1441, %v460_v19  }
 0x1a3   : > { %v665_v22 = vpop.xlane.xlu0 %664 }
 0x1a4   : > { %v671_v24 = vsub.f32 %v665_v22, %v669_v21 }
 0x1a6   : > { %v673_v27 = vmul.f32 0.5, %v671_v24 }
 0x1a7   : > { %v668_v28 = vpop.xlane.xlu1 %667 }
 0x1a8   : > { %v675_v29 = vadd.f32 %v673_v27, %v669_v21  ;;  %v672_v30 = vsub.f32 %v668_v28, %v670_v26  ;;  %v1453_v27 = vld [vmem:[%s2048_s5 + $0x10] sm:$0xff]   ;;  %v1454_v28 = vld [vmem:[%s2048_s5 + $0x18] sm:$0xff]  }
 0x1aa   : > { %vm677_vm14 = vcmp.ge.f32.partialorder %v675_v29, 0.5  ;;  %v674_v31 = vmul.f32 0.5, %v672_v30 }
 0x1ab   : > { %v679_v32 = vsel %vm677_vm14, 0.0, %v675_v29  ;;  %v487_v34 = vpop.permute.xlu0 %486  ;;  %v492_v36 = vpop.permute.xlu1 %491  ;;  %v1251_v43 = vsel %vm677_vm14, 1.0, %v1581_v4 }
 0x1ac   : > { %682 = vst.msk [vmem:[#allocation4] sm:$0xff] %vm681_vm13, %v679_v32  ;;  %v676_v37 = vadd.f32 %v674_v31, %v670_v26  ;;  %v574_v38 = vadd.f32 %v1800_v23, %v487_v34  ;;  %v577_v39 = vadd.f32 %v1802_v25, %v492_v36  ;;  %v441_v23 = vld [vmem:[%s2047_s4 + $0x8] sm:$0xff]  ;;  %v924_v36 = vld [vmem:[#allocation6 + $0x10] sm:$0xff] }
 0x1ae   : > { %vm678_vm15 = vcmp.ge.f32.partialorder %v676_v37, 0.5  ;;  %v602_v40 = vsub.f32 %v574_v38, %v596_v33  ;;  %v603_v41 = vsub.f32 %v577_v39, %v597_v35 }
 0x1af   : > { %v680_v42 = vsel %vm678_vm15, 0.0, %v676_v37  ;;  %v1252_v44 = vsel %vm678_vm15, 1.0, %v1581_v4  ;;  %v704_v5 = vpop.permute.xlu1 %703 }
 0x1b0   : > { %683 = vst.msk [vmem:[#allocation4 + $0x8] sm:$0xff] %vm681_vm13, %v680_v42  ;;  %v608_v45 = vmul.f32 0.5, %v602_v40  ;;  %v609_v46 = vmul.f32 0.5, %v603_v41  ;;  %v1442_v47 = vpack.i.bf16 %v1252_v44, %v1251_v43  ;;  %v922_v40 = vld [vmem:[#allocation6] sm:$0xff]  ;;  %v925_v44 = vld [vmem:[#allocation6 + $0x18] sm:$0xff] }
 0x1b2   : > { %v614_v48 = vadd.f32 %v608_v45, %v596_v33  ;;  %v615_v49 = vadd.f32 %v609_v46, %v597_v35  ;;  %1443 = vperm.xlu0 %1440, %v1442_v47  }
 0x1b3   : > { %v818_v29 = vpop.permute.xlu1 %817 }
 0x1b4   : > { %vm620_vm0 = vcmp.ge.f32.partialorder %v614_v48, 1.0  ;;  %vm621_vm1 = vcmp.ge.f32.partialorder %v615_v49, 1.0 }
 0x1b5   : > { %v626_v25 = vsel %vm620_vm0, 0.0, %v614_v48  ;;  %v627_v50 = vsel %vm621_vm1, 0.0, %v615_v49  ;;  %v1243_v59 = vsel %vm620_vm0, 1.0, %v1581_v4  ;;  %v1244_v60 = vsel %vm621_vm1, 1.0, %v1581_v4 }
 0x1b6   : > { %708 = vperm.xlu0 %1440, %v441_v23   ;;  %632 = vst.msk [vmem:[#allocation3] sm:$0xff] %vm476_vm3, %v626_v25  ;;  %633 = vst.msk [vmem:[#allocation3 + $0x8] sm:$0xff] %vm476_vm3, %v627_v50  ;;  %v923_v23 = vld [vmem:[#allocation6 + $0x8] sm:$0xff] }
 0x1b7   : > { %v808_v31 = vpop.permute.xlu1 %807 }
 0x1ba   : > { %822 = vperm.xlu0 %1440, %v457_v51  }
 0x1bb   : > { %v798_v33 = vpop.permute.xlu1 %797 }
 0x1be   : > { %812 = vperm.xlu0 %1440, %v455_v52  }
 0x1bf   : > { %v788_v38 = vpop.permute.xlu1 %787 }
 0x1c2   : > { %802 = vperm.xlu0 %1440, %v453_v53  }
 0x1c6   : > { %792 = vperm.xlu0 %1440, %v451_v54   ;;  %v928_v54 = vld [vmem:[#allocation6 + $0x30] sm:$0xff] }
 0x1ca   : > { %1005 = vperm.xlu0 %1440, %v461_v55  }
 0x22d   : > { %v1444_v56 = vpop.permute.xlu0 %1443 }
 0x22e   : > { %v1446_v57 = vunpack.i.h.bf16 %v1444_v56  ;;  %v1445_v58 = vunpack.i.l.bf16 %v1444_v56 }
 0x230   : > { %v698_v61 = vmul.f32 %v1445_v58, %v1243_v59  ;;  %v699_v62 = vmul.f32 %v1446_v57, %v1244_v60  ;;  %v926_v60 = vld [vmem:[#allocation6 + $0x20] sm:$0xff] }
 0x231   : > { %v709_v11 = vpop.permute.xlu0 %708 }
 0x232   : > { %v700_v63 = vpack.c.bf16 %v699_v62, %v698_v61 }
 0x234   : > { %1328 = vmatpush3.bf16.msra.mxu1 %v700_v63 }
 0x235   : > { %v823_v30 = vpop.permute.xlu0 %822 }
 0x237   : > { %1330 = vmatmul.mubr.msk.bf16.vlgmr.msra.gmra.mxu1 %vm529_vm7, %v1450_v0 }
 0x238   : > { %1335 = vmatprep.mubr.msk.bf16.mxu1 %vm529_vm7, %v1451_v3 }
 0x239   : > { %v813_v32 = vpop.permute.xlu0 %812 }
 0x23d   : > { %v803_v34 = vpop.permute.xlu0 %802 }
 0x241   : > { %v793_v48 = vpop.permute.xlu0 %792 }
 0x2f7   : > { %v753_v6 = vpop.f32.mrf.mxu1 }
 0x2f8   : > { %v754_v7 = vadd.f32 %v753_v6, %v704_v5  ;;  %v929_v5 = vld [vmem:[#allocation6 + $0x38] sm:$0xff] }
 0x2f9   : > { %v1331_v9 = vpop.f32.mrf.mxu1 }
 0x2fa   : > { %v762_v10 = vadd.f32 %v754_v7, %v1754_v1 }
 0x2fb   : > { %v756_v12 = vpop.f32.mrf.mxu1 }
 0x2fc   : > { %764 = vst.msk [vmem:[%s1729_s15] sm:$0xff] %vm476_vm3, %v762_v10  ;;  %v768_v13 = vsub.f32 %v762_v10, %v766_v8  ;;  %v757_v14 = vadd.f32 %v756_v12, %v709_v11  ;;  %v927_v12 = vld [vmem:[#allocation6 + $0x28] sm:$0xff] }
 0x2fd   : > { %v1332_v16 = vpop.f32.mrf.mxu1 }
 0x2fe   : > { %v770_v17 = vmul.f32 0.5, %v768_v13  ;;  %v763_v18 = vadd.f32 %v757_v14, %v1756_v2  ;;  %v1452_v2 = vld [vmem:[%s2048_s5 + $0x8] sm:$0xff]  }
 0x300   : > { %765 = vst.msk [vmem:[%s1729_s15 + $0x8] sm:$0xff] %vm476_vm3, %v763_v18  ;;  %v769_v19 = vsub.f32 %v763_v18, %v767_v15  ;;  %v772_v21 = vadd.f32 %v770_v17, %v766_v8 }
 0x302   : > { %v771_v22 = vmul.f32 0.5, %v769_v19  ;;  %vm774_vm2 = vcmp.ge.f32.partialorder %v772_v21, 1.0 }
 0x303   : > { %v776_v24 = vsel %vm774_vm2, 0.0, %v772_v21 }
 0x304   : > { %v773_v26 = vadd.f32 %v771_v22, %v767_v15  ;;  %778 = vst.msk [vmem:[#allocation5] sm:$0xff] %vm476_vm3, %v776_v24 }
 0x306   : > { %vm775_vm4 = vcmp.ge.f32.partialorder %v773_v26, 1.0 }
 0x307   : > { %v777_v1 = vsel %vm775_vm4, 0.0, %v773_v26  ;;  %vm1261_vm5 = vmpackc.low %vm775_vm4, %vm774_vm2 }
 0x308   : > { %779 = vst.msk [vmem:[#allocation5 + $0x8] sm:$0xff] %vm476_vm3, %v777_v1  ;;  %1333 = vmatprep.subr.msk.bf16.mxu1 %vm1261_vm5, %v1584_v20 }
 0x309   : > { %1334 = vmatpush3.bf16.msk.msra.mxu1 %vm1261_vm5, %v1584_v20 }
 0x30c   : > { %1336 = vmatmul.mubr.msk.bf16.vlgmr.msra.gmra.mxu1 %vm529_vm7, %v1452_v2 }
 0x30d   : > { %1339 = vmatprep.mubr.msk.bf16.mxu1 %vm529_vm7, %v1453_v27 }
 0x314   : > { %1340 = vmatmul.mubr.msk.bf16.gmra.mxu1 %vm529_vm7, %v1454_v28 }
 0x3cc   : > { %v1337_v35 = vpop.f32.mrf.mxu1 }
 0x3cd   : > { %v900_v37 = vadd.f32 %v1337_v35, %v798_v33 }
 0x3ce   : > { %v891_v39 = vpop.f32.mrf.mxu1 }
 0x3cf   : > { %v932_v41 = vsub.f32 %v900_v37, %v924_v36  ;;  %v892_v42 = vadd.f32 %v891_v39, %v788_v38 }
 0x3d0   : > { %v1338_v43 = vpop.f32.mrf.mxu1 }
 0x3d1   : > { %v940_v45 = vmul.f32 0.5, %v932_v41  ;;  %v930_v46 = vsub.f32 %v892_v42, %v922_v40  ;;  %v903_v47 = vadd.f32 %v1338_v43, %v803_v34 }
 0x3d2   : > { %v894_v49 = vpop.f32.mrf.mxu1 }
 0x3d3   : > { %v1908_v25 = vadd.f32 %v940_v45, %v924_v36  ;;  %v938_v50 = vmul.f32 0.5, %v930_v46  ;;  %v933_v51 = vsub.f32 %v903_v47, %v925_v44  ;;  %v895_v52 = vadd.f32 %v894_v49, %v793_v48 }
 0x3d4   : > { %v1341_v53 = vpop.f32.mrf.mxu1 }
 0x3d5   : > { %v946_v55 = vadd.f32 %v938_v50, %v922_v40  ;;  %v941_v56 = vmul.f32 0.5, %v933_v51  ;;  %v931_v57 = vsub.f32 %v895_v52, %v923_v23  ;;  %v916_v58 = vadd.f32 %v1341_v53, %v818_v29 }
 0x3d6   : > { %v907_v59 = vpop.f32.mrf.mxu1  ;;  %vm956_vm6 = vcmp.ge.f32.partialorder %v1908_v25, 1.0 }
 0x3d7   : > { %v949_v61 = vadd.f32 %v941_v56, %v925_v44  ;;  %v939_v62 = vmul.f32 0.5, %v931_v57  ;;  %v936_v63 = vsub.f32 %v916_v58, %v928_v54  ;;  %v908_v0 = vadd.f32 %v907_v59, %v808_v31  ;;  %v1455_v31 = vld [vmem:[%s2050_s7] sm:$0xff]  }
 0x3d8   : > { %v1342_v3 = vpop.f32.mrf.mxu1  ;;  %v964_v6 = vsel %vm956_vm6, 0.0, %v1908_v25  ;;  %vm954_vm7 = vcmp.ge.f32.partialorder %v946_v55, 1.0 }
 0x3d9   : > { %v947_v7 = vadd.f32 %v939_v62, %v923_v23  ;;  %v944_v8 = vmul.f32 0.5, %v936_v63  ;;  %v934_v9 = vsub.f32 %v908_v0, %v926_v60  ;;  %v919_v10 = vadd.f32 %v1342_v3, %v823_v30  ;;  %972 = vst.msk [vmem:[#allocation6 + $0x10] sm:$0xff] %vm476_vm3, %v964_v6 }
 0x3da   : > { %v910_v11 = vpop.f32.mrf.mxu1  ;;  %vm957_vm8 = vcmp.ge.f32.partialorder %v949_v61, 1.0  ;;  %v962_v13 = vsel %vm954_vm7, 0.0, %v946_v55 }
 0x3db   : > { %v952_v14 = vadd.f32 %v944_v8, %v928_v54  ;;  %v942_v15 = vmul.f32 0.5, %v934_v9  ;;  %v937_v16 = vsub.f32 %v919_v10, %v929_v5  ;;  %v911_v17 = vadd.f32 %v910_v11, %v813_v32  ;;  %970 = vst.msk [vmem:[#allocation6] sm:$0xff] %vm476_vm3, %v962_v13  ;;  %vm1280_vm0 = vmpackc.low %vm957_vm8, %vm956_vm6 }
 0x3dc   : > { %v965_v18 = vsel %vm957_vm8, 0.0, %v949_v61  ;;  %vm955_vm9 = vcmp.ge.f32.partialorder %v947_v7, 1.0 }
 0x3dd   : > { %v950_v19 = vadd.f32 %v942_v15, %v926_v60  ;;  %v945_v21 = vmul.f32 0.5, %v937_v16  ;;  %v935_v22 = vsub.f32 %v911_v17, %v927_v12  ;;  %vm960_vm10 = vcmp.ge.f32.partialorder %v952_v14, 1.0  ;;  %973 = vst.msk [vmem:[#allocation6 + $0x18] sm:$0xff] %vm476_vm3, %v965_v18  ;;  %vm1282_vm1 = vmpackc.low %vm955_vm9, %vm954_vm7 }
 0x3de   : > { %v968_v24 = vsel %vm960_vm10, 0.0, %v952_v14  ;;  %v963_v26 = vsel %vm955_vm9, 0.0, %v947_v7 }
 0x3df   : > { %v953_v1 = vadd.f32 %v945_v21, %v929_v5  ;;  %v943_v2 = vmul.f32 0.5, %v935_v22  ;;  %976 = vst.msk [vmem:[#allocation6 + $0x30] sm:$0xff] %vm476_vm3, %v968_v24  ;;  %vm958_vm11 = vcmp.ge.f32.partialorder %v950_v19, 1.0  ;;  %971 = vst.msk [vmem:[#allocation6 + $0x8] sm:$0xff] %vm476_vm3, %v963_v26 }
 0x3e0   : > { %v966_v27 = vsel %vm958_vm11, 0.0, %v950_v19 }
 0x3e1   : > { %v951_v28 = vadd.f32 %v943_v2, %v927_v12  ;;  %vm961_vm12 = vcmp.ge.f32.partialorder %v953_v1, 1.0  ;;  %974 = vst.msk [vmem:[#allocation6 + $0x20] sm:$0xff] %vm476_vm3, %v966_v27 }
 0x3e2   : > { %v969_v29 = vsel %vm961_vm12, 0.0, %v953_v1  ;;  %vm1276_vm13 = vmpackc.low %vm961_vm12, %vm960_vm10 }
 0x3e3   : > { %977 = vst.msk [vmem:[#allocation6 + $0x38] sm:$0xff] %vm476_vm3, %v969_v29  ;;  %1344 = vmatpush3.bf16.msk.msra.mxu0 %vm1276_vm13, %v1584_v20  ;;  %vm959_vm14 = vcmp.ge.f32.partialorder %v951_v28, 1.0 }
 0x3e4   : > { %1345 = vmatprep.subr.bf16.mxu0 %v1581_v4  ;;  %v967_v30 = vsel %vm959_vm14, 0.0, %v951_v28  ;;  %vm1278_vm15 = vmpackc.low %vm959_vm14, %vm958_vm11 }
 0x3e5   : > { %975 = vst.msk [vmem:[#allocation6 + $0x28] sm:$0xff] %vm476_vm3, %v967_v30 }
 0x3e7   : > { %1346 = vmatpush3.bf16.msk.msra.mxu0 %vm1278_vm15, %v1584_v20 }
 0x3e8   : > { %1347 = vmatprep.subr.bf16.mxu0 %v1581_v4 }
 0x3eb   : > { %1348 = vmatpush3.bf16.msk.msra.mxu0 %vm1280_vm0, %v1584_v20 }
 0x3ec   : > { %1349 = vmatprep.subr.bf16.mxu0 %v1581_v4 }
 0x3ef   : > { %1350 = vmatpush3.bf16.msk.msra.mxu0 %vm1282_vm1, %v1584_v20 }
 0x3f2   : > { %1352 = vmatmul.mubr.msk.bf16.vlgmr.msra.gmra.mxu0 %vm476_vm3, %v1455_v31 }
 0x3f3   : > { %1469 = shalt.err (!%p1466_p9)
}
 0x3f4   : > { %s1470_s14 = scalar_lea.hbm %s1949_s21, 128  ;;  %s1474_s23 = scalar_lea.hbm %s2053_s10, 512 }
 0x3f5   : > { %p1471_p10 = scmp.ne.s32.totalorder %s1949_s21, %s1470_s14  ;;  %p1475_p13 = scmp.lt.s32.totalorder %s1949_s21, %s2053_s10 }
 0x3f6   : > { %p1476_p0 = scmp.lt.s32.totalorder %s1474_s23, %s1470_s14 }
 0x3f7   : > { %p1472_p11 = pnand %p1471_p10, %p1697_p3 }
 0x3f8   : > { %p1477_p1 = por %p1476_p0, %p1475_p13 }
 0x3f9   : > { %p1473_p12 = pneg %p1472_p11 }
 0x3fb   : > { %p1478_p2 = pnand %p1477_p1, %p1473_p12 }
 0x3fd   : > { %1481 = shalt.err (!%p1478_p2)
}
 0x3fe   : > { %s1586_s28 = smov 64   ;;  %s1587_s16 = smov 4   ;;  %v1001_v4 = vpop.permute.xlu1 %1000  ;;  %v1057_v33 = vld [vmem:[%s1729_s15] sm:$0xff]  ;;  %v1006_v36 = vpop.permute.xlu0 %1005  ;;  %v1058_v39 = vld [vmem:[%s1729_s15 + $0x8] sm:$0xff] }
 0x3ff   : > { %1356 = dma.vmem_to_hbm [thread:$0]  (%p1697_p3), %s1952_s22, 128, %s1949_s21, %s1069_s25, %s1586_s28, %s1586_s28, %s1587_s16  }
 0x400   : > { %s1289_s17 = sshll.u32 %s1943_s19, 7  ;;  %s1084_s30 = sshll.u32 %s1729_s15, 4  ;;  %s1988_s30 = int_to_ptr.vmem [resolvable:$true] %s1084_s30 }
 0x401   : > { %s1986_s22 = scalar_lea.hbm %s2052_s9, %s1289_s17  ;;  %s1064_s19 = scalar_lea.sflag [#allocation8], %s1718_s12 }
 0x402   : > { %s1482_s25 = scalar_lea.vmem %s1988_s30, 256  ;;  %s1588_s29 = smov [#allocation7]  }
 0x403   : > { %p1483_p4 = scmp.ne.s32.totalorder %s1988_s30, %s1482_s25  ;;  %s1486_s18 = sshll.u32 %s1588_s29, 4  ;;  %s1487_s18 = int_to_ptr.vmem [resolvable:$false] %s1486_s18 }
 0x404   : > { %s1488_s23 = scalar_lea.vmem %s1487_s18, 512  ;;  %p1489_p7 = scmp.lt.s32.totalorder %s1988_s30, %s1487_s18 }
 0x405   : > { %p1484_p5 = pnand %p1483_p4, %p1697_p3  ;;  %p1490_p9 = scmp.lt.s32.totalorder %s1488_s23, %s1482_s25 }
 0x407   : > { %p1485_p6 = pneg %p1484_p5  ;;  %p1491_p10 = por %p1490_p9, %p1489_p7 }
 0x409   : > { %p1492_p11 = pnand %p1491_p10, %p1485_p6 }
 0x4b2   : > { %v1050_v20 = vpop.f32.mrf.mxu0 }
 0x4b3   : > { %v1051_v32 = vadd.f32 %v1050_v20, %v1001_v4 }
 0x4b4   : > { %v1353_v34 = vpop.f32.mrf.mxu0 }
 0x4b5   : > { %v1059_v35 = vadd.f32 %v1057_v33, %v1051_v32 }
 0x4b6   : > { %v1053_v37 = vpop.f32.mrf.mxu0 }
 0x4b7   : > { %1061 = vst.msk [vmem:[%s1729_s15] sm:$0xff] %vm476_vm3, %v1059_v35  ;;  %v1054_v38 = vadd.f32 %v1053_v37, %v1006_v36 }
 0x4b8   : > { %v1354_v40 = vpop.f32.mrf.mxu0 }
 0x4b9   : > { %v1060_v41 = vadd.f32 %v1058_v39, %v1054_v38 }
 0x4bb   : > { %1062 = vst.msk [vmem:[%s1729_s15 + $0x8] sm:$0xff] %vm476_vm3, %v1060_v41 }
 0x4bc   : > { %1495 = shalt.err (!%p1492_p11)
}
 0x4bd   : > { %s1496_s15 = scalar_lea.hbm %s1986_s22, 256  ;;  %s1500_s28 = scalar_lea.hbm %s2052_s9, 1024 }
 0x4be   : > { %p1497_p12 = scmp.ne.s32.totalorder %s1986_s22, %s1496_s15  ;;  %p1501_p1 = scmp.lt.s32.totalorder %s1986_s22, %s2052_s9 }
 0x4bf   : > { %p1502_p2 = scmp.lt.s32.totalorder %s1500_s28, %s1496_s15 }
 0x4c0   : > { %p1498_p13 = pnand %p1497_p12, %p1697_p3 }
 0x4c1   : > { %p1503_p4 = por %p1502_p2, %p1501_p1 }
 0x4c2   : > { %p1499_p0 = pneg %p1498_p13 }
 0x4c4   : > { %p1504_p5 = pnand %p1503_p4, %p1499_p0 }
 0x4c6   : > { %1507 = shalt.err (!%p1504_p5)
}
 0x4c7   : > { %s1589_s14 = smov 128   ;;  %s1590_s21 = smov 8  }
 0x4c8   : > { %1355 = dma.vmem_to_hbm [thread:$0]  (%p1697_p3), %s1988_s30, 256, %s1986_s22, %s1064_s19, %s1589_s14, %s1589_s14, %s1590_s21  }
 0x4c9 PF: > { %p1366_p6 = scmp.ge.s32.totalorder %s1578_s20, 2  ;;  %s1117_s25 = sand.u32 1, %s1550_s13  }
 0x4ca   : > { %s1118_s29 = scalar_lea.sflag [#allocation8], %s1117_s25 }
 0x4cb   : > { %p1360_p7 = pnand %p1366_p6, %p1706_p8 }
 0x4cd   : > { %p1361_p9 = pneg %p1360_p7 }
 0x4cf   : > { %1541 = dma.done.wait (%p1361_p9), %s1118_s29, 256  }
 0x4d0   : > { %1543 = vsyncadd (%p1361_p9), %s1118_s29, 4294967040  ;;  %s1127_s18 = scalar_lea.sflag [#allocation10], %s1117_s25 }
 0x4d1   : > { %1545 = dma.done.wait (%p1361_p9), %s1127_s18, 128  }
 0x4d2   : > { %1547 = vsyncadd (%p1361_p9), %s1127_s18, 4294967168  ;;  %s27_s20 = sadd.s32 1, %s1578_s20   ;;  %s2069_s13 = sld [smem:[#allocation13_spill]] }
 0x4d3   : > { %p24_p10 = scmp.ge.s32.totalorder %s27_s20, 6   ;;  %s2070_s14 = sld [smem:[#allocation14_spill]] }
 0x4d4   : > { %s2071_s15 = sld [smem:[#allocation19_spill]] }
 0x4d5   : > { %s2072_s16 = sld [smem:[#allocation15_spill]]  ;;  %26 = sbr.rel (!%p24_p10) target bundleno = 7 (0x7), region = 112 }
 0x4d6   : > { %s2073_s17 = sld [smem:[#allocation16_spill]] }
 0x4d7   : > { %s2074_s18 = sld [smem:[#allocation17_spill]] }
 0x4d8   : > { %s2075_s19 = sld [smem:[#allocation18_spill]] }
 0x4da   :  { %1132 = vsyncpa [#allocation8], 1 }
 0x4db   :  { %1134 = vsyncpa [#allocation8 + $0x1], 1 }
 0x4dc   :  { %1135 = vsyncpa [#allocation10], 1 }
 0x4dd   :  { %1137 = vsyncpa [#allocation10 + $0x1], 1 }

</bundles_post_ra>
